<compile_context>
chip_gen: v6e
topology: v6e:2x2x1
jax: 0.10.0
libtpu: 0.0.40
codegen_flags: <defaults>
</compile_context>

<pallas_src>
import jax
import jax.numpy as jnp
from jax.experimental import pallas as pl
from jax.experimental.pallas import tpu as pltpu


def _round_up(x, m):
    return (x + m - 1) // m * m


def _pick_time_chunk(T, max_chunk=32):
    """Largest divisor of T that is <= max_chunk (steps per grid iteration)."""
    for c in range(min(T, max_chunk), 0, -1):
        if T % c == 0:
            return c
    return 1


def _lstm_kernel(xp_ref, whh_ref, wfc_ref, bfc_ref, out_ref, h_scr, c_scr):
    """One grid step = TC time steps of the LSTM recurrence for one batch tile.

    xp_ref : [TC, BT, 4*Hp] bf16  precomputed x @ W_ih + b (time-major chunk),
                                  gate column order [i, f, o, g]
    whh_ref: [Hp, 4*Hp]     bf16  recurrent weights (same gate order)
    wfc_ref: [Hp, Op]       f32   head weights (zero-padded)
    bfc_ref: [1, Op]        f32   head bias (zero-padded)
    out_ref: [BT, Op]       f32   sigmoid(fc(h_T)) (padded cols hold sigmoid(0))
    h_scr  : [BT, Hp]       bf16  recurrent hidden state (persists over time axis)
    c_scr  : [BT, Hp]       f32   recurrent cell state
    """
    tc = pl.program_id(1)  # time-chunk index (inner, "arbitrary" axis)

    @pl.when(tc == 0)
    def _():
        h_scr[...] = jnp.zeros_like(h_scr)
        c_scr[...] = jnp.zeros_like(c_scr)

    Hp = h_scr.shape[1]
    TC = xp_ref.shape[0]
    w_hh = whh_ref[...]  # resident in VMEM for the whole chunk

    def step(t, carry):
        h, c = carry  # h: bf16, c: f32
        # Only the h-side matmul sits on the serial critical path.
        gates = jnp.dot(h, w_hh, preferred_element_type=jnp.float32) + xp_ref[t]
        # Fused activations over contiguous, lane-aligned slabs (order i,f,o,g).
        sig = jax.nn.sigmoid(gates[:, 0:3 * Hp])
        i_g = sig[:, 0:Hp]
        f_g = sig[:, Hp:2 * Hp]
        o_g = sig[:, 2 * Hp:3 * Hp]
        g_g = jnp.tanh(gates[:, 3 * Hp:4 * Hp])
        c = f_g * c + i_g * g_g
        h = (o_g * jnp.tanh(c)).astype(jnp.bfloat16)
        return h, c

    h, c = jax.lax.fori_loop(0, TC, step, (h_scr[...], c_scr[...]),
                             unroll=min(TC, 8))
    h_scr[...] = h
    c_scr[...] = c

    @pl.when(tc == pl.num_programs(1) - 1)
    def _():
        # Off the serial path: runs once per batch tile.
        y = jnp.dot(h.astype(jnp.float32), wfc_ref[...],
                    preferred_element_type=jnp.float32) + bfc_ref[...]
        out_ref[...] = jax.nn.sigmoid(y).astype(out_ref.dtype)


def candle_lstm_forward(tokens, params):
    """tokens: int32 [B, T]; returns float32 [B, output_dim]."""
    emb = params["embedding"]          # [V, E]
    w_ih = params["w_ih"]              # [E, 4H]  gate order i,f,g,o (PyTorch)
    w_hh = params["w_hh"]              # [H, 4H]
    b = params["b"]                    # [1, 4H]  (b_ih + b_hh)
    w_fc = params["w_fc"]              # [H, O]
    b_fc = params["b_fc"]              # [1, O]

    B, T = tokens.shape
    E = emb.shape[1]
    H = w_hh.shape[0]
    O = w_fc.shape[1]
    Hp = _round_up(H, 128)             # lane-aligned hidden dim
    Op = _round_up(O, 128)             # lane-dense output store
    Bp = _round_up(B, 8)               # sublane-aligned batch dim

    # --- pad each gate block of the 4H axis to Hp and reorder gates to
    #     [i, f, o, g] so all sigmoid gates are contiguous. Zero padding keeps
    #     padded hidden units exactly 0 (gates=0 -> i=f=o=0.5, g=0 -> c=h=0). --
    def pad_gate_cols(w, rows_to=None):
        r = w.shape[0]
        wg = w.reshape(r, 4, H)
        wg = wg[:, jnp.array([0, 1, 3, 2]), :]          # i,f,g,o -> i,f,o,g
        wg = jnp.pad(wg, ((0, 0), (0, 0), (0, Hp - H)))
        w = wg.reshape(r, 4 * Hp)
        if rows_to is not None and rows_to > r:
            w = jnp.pad(w, ((0, rows_to - r), (0, 0)))
        return w

    w_ih_p = pad_gate_cols(w_ih)                                   # [E, 4Hp] f32
    b_p = pad_gate_cols(b)                                         # [1, 4Hp] f32
    w_hh_p = pad_gate_cols(w_hh, rows_to=Hp).astype(jnp.bfloat16)  # [Hp, 4Hp]
    w_fc_p = jnp.pad(w_fc, ((0, Hp - H), (0, Op - O)))             # [Hp, Op]
    b_fc_p = jnp.pad(b_fc, ((0, 0), (0, Op - O)))                  # [1, Op]

    # --- embedding lookup + input projection, hoisted off the serial path.
    #     Time-major via transposing the tiny token matrix (no big activation
    #     transpose in HBM); result cast to bf16 (halves streamed bytes). -----
    x_emb = jnp.take(emb, tokens.T, axis=0)                        # [T, B, E]
    x_proj = (x_emb.reshape(T * B, E) @ w_ih_p + b_p
              ).reshape(T, B, 4 * Hp)                              # [T, B, 4Hp]
    x_proj = jnp.pad(x_proj, ((0, 0), (0, Bp - B), (0, 0)))        # [T, Bp, 4Hp]
    x_proj = x_proj.astype(jnp.bfloat16)

    TC = _pick_time_chunk(T)
    # Batch-tile axis: lets v7x's second TensorCore take independent rows.
    n_btiles = 2 if (Bp >= 16 and Bp % 16 == 0) else 1
    BT = Bp // n_btiles
    grid = (n_btiles, T // TC)

    grid_spec = pltpu.PrefetchScalarGridSpec(
        num_scalar_prefetch=0,
        grid=grid,
        in_specs=[
            # streamed per time chunk (double-buffered by default)
            pl.BlockSpec((TC, BT, 4 * Hp), lambda b, t: (t, b, 0)),
            # loop-invariant weights: single-buffered
            pl.BlockSpec((Hp, 4 * Hp), lambda b, t: (0, 0),
                         pipeline_mode=pl.Buffered(1)),
            pl.BlockSpec((Hp, Op), lambda b, t: (0, 0),
                         pipeline_mode=pl.Buffered(1)),
            pl.BlockSpec((1, Op), lambda b, t: (0, 0),
                         pipeline_mode=pl.Buffered(1)),
        ],
        out_specs=pl.BlockSpec((BT, Op), lambda b, t: (b, 0)),
        scratch_shapes=[
            pltpu.VMEM((BT, Hp), jnp.bfloat16),   # h (bf16 MXU operand)
            pltpu.VMEM((BT, Hp), jnp.float32),    # c (f32 state)
        ],
    )

    # VMEM budget: single-buffered weights + double-buffered x_proj chunk +
    # scratch + output, with 2x headroom (min 32 MiB, capped below 128 MiB).
    est_bytes = (Hp * 4 * Hp * 2            # W_hh bf16
                 + Hp * Op * 4 + Op * 4     # W_fc, b_fc f32
                 + 2 * TC * BT * 4 * Hp * 2  # x_proj chunk, double-buffered
                 + 2 * BT * Op * 4          # output, double-buffered
                 + BT * Hp * (2 + 4))       # h/c scratch
    vmem_limit = int(min(max(2 * est_bytes, 32 << 20), 100 << 20))

    out_p = pl.pallas_call(
        _lstm_kernel,
        grid_spec=grid_spec,
        out_shape=jax.ShapeDtypeStruct((Bp, Op), jnp.float32),
        compiler_params=pltpu.CompilerParams(
            dimension_semantics=("parallel", "arbitrary"),
            vmem_limit_bytes=vmem_limit),
    )(x_proj, w_hh_p, w_fc_p, b_fc_p)
    return out_p[:B, :O]


def init_params(key, vocab_size, embedding_dim, hidden_dim, output_dim):
    ks = jax.random.split(key, 7)
    s = 0.1
    emb = s * jax.random.normal(ks[0], (vocab_size, embedding_dim), jnp.float32)
    # PyTorch stores weight_ih as [4H, E]; we keep the transposed [E, 4H]
    # layout so the projection is x @ W_ih directly (same math).
    w_ih = s * jax.random.normal(ks[1], (embedding_dim, 4 * hidden_dim), jnp.float32)
    w_hh = s * jax.random.normal(ks[2], (hidden_dim, 4 * hidden_dim), jnp.float32)
    b_ih = s * jax.random.normal(ks[3], (1, 4 * hidden_dim), jnp.float32)
    b_hh = s * jax.random.normal(ks[4], (1, 4 * hidden_dim), jnp.float32)
    w_fc = s * jax.random.normal(ks[5], (hidden_dim, output_dim), jnp.float32)
    b_fc = s * jax.random.normal(ks[6], (1, output_dim), jnp.float32)
    return {
        "embedding": emb,
        "w_ih": w_ih,
        "w_hh": w_hh,
        "b": b_ih + b_hh,
        "w_fc": w_fc,
        "b_fc": b_fc,
    }


def _reference_forward(tokens, params):
    """Pure-JAX f32 reference (PyTorch CandleLSTM semantics, gate order i,f,g,o)."""
    emb, w_ih, w_hh = params["embedding"], params["w_ih"], params["w_hh"]
    b, w_fc, b_fc = params["b"], params["w_fc"], params["b_fc"]
    B, T = tokens.shape
    H = w_hh.shape[0]
    x = jnp.take(emb, tokens, axis=0)   # [B, T, E]
    h = jnp.zeros((B, H), jnp.float32)
    c = jnp.zeros((B, H), jnp.float32)
    for t in range(T):
        gates = x[:, t, :] @ w_ih + h @ w_hh + b
        i = jax.nn.sigmoid(gates[:, :H])
        f = jax.nn.sigmoid(gates[:, H:2 * H])
        g = jnp.tanh(gates[:, 2 * H:3 * H])
        o = jax.nn.sigmoid(gates[:, 3 * H:])
        c = f * c + i * g
        h = o * jnp.tanh(c)
    return jax.nn.sigmoid(h @ w_fc + b_fc)


if __name__ == "__main__":
    vocab_size, embedding_dim, hidden_dim, output_dim = 50, 32, 32, 8
    B, T = 2, 8

    key = jax.random.PRNGKey(0)
    k_tok, k_par = jax.random.split(key)
    tokens = jax.random.randint(k_tok, (B, T), 0, vocab_size, dtype=jnp.int32)
    params = init_params(k_par, vocab_size, embedding_dim, hidden_dim, output_dim)

    out = candle_lstm_forward(tokens, params)
    out = jax.block_until_ready(out)
    assert out.shape == (B, output_dim)

    ref = _reference_forward(tokens, params)
    # Loose tolerance: recurrent matmul / streamed activations run in bf16.
    assert float(jnp.max(jnp.abs(out - ref))) < 5e-2

    print("KERNEL_OK")
</pallas_src>

<mosaic_0001>
module attributes {stable_mosaic.version = 11 : i64} {
  func.func @_lstm_kernel(%arg0: i32, %arg1: i32, %arg2: memref<8x8x512xbf16, #tpu.memory_space<vmem>>, %arg3: memref<128x512xbf16, #tpu.memory_space<vmem>>, %arg4: memref<128x128xf32, #tpu.memory_space<vmem>>, %arg5: memref<1x128xf32, #tpu.memory_space<vmem>>, %arg6: memref<8x128xf32, #tpu.memory_space<vmem>>, %arg7: memref<8x128xbf16, #tpu.memory_space<vmem>>, %arg8: memref<8x128xf32, #tpu.memory_space<vmem>>) attributes {dimension_semantics = [#tpu.dimension_semantics<parallel>, #tpu.dimension_semantics<arbitrary>], iteration_bounds = array<i64: 1, 1>, scalar_prefetch = 0 : i64, scratch_operands = 2 : i64, tpu.core_type = #tpu.core_type<tc>, window_params = [{transform_indices = @transform_0, window_bounds = array<i64: 8, 8, 512>}, {pipeline_mode = #tpu.pipeline_mode<synchronous>, transform_indices = @transform_1, window_bounds = array<i64: 128, 512>}, {pipeline_mode = #tpu.pipeline_mode<synchronous>, transform_indices = @transform_2, window_bounds = array<i64: 128, 128>}, {pipeline_mode = #tpu.pipeline_mode<synchronous>, transform_indices = @transform_3, window_bounds = array<i64: 1, 128>}, {transform_indices = @transform_4, window_bounds = array<i64: 8, 128>}]} {
    %c0_i32 = arith.constant 0 : i32
    %0 = arith.cmpi eq, %arg1, %c0_i32 : i32
    %1 = arith.extui %0 : i1 to i32
    %c0_i32_0 = arith.constant 0 : i32
    %2 = arith.cmpi ne, %1, %c0_i32_0 : i32
    scf.if %2 {
      %cst_44 = arith.constant 0.000000e+00 : bf16
      %195 = vector.broadcast %cst_44 : bf16 to vector<8x128xbf16>
      %c0_45 = arith.constant 0 : index
      %c0_46 = arith.constant 0 : index
      %196 = vector.load %arg7[%c0_45, %c0_46] : memref<8x128xbf16, #tpu.memory_space<vmem>>, vector<8x128xbf16>
      tpu.vector_store %arg7[%c0_45, %c0_46], %195 {strides = array<i32>} : memref<8x128xbf16, #tpu.memory_space<vmem>>, vector<8x128xbf16>,
      %cst_47 = arith.constant 0.000000e+00 : f32
      %197 = vector.broadcast %cst_47 : f32 to vector<8x128xf32>
      %c0_48 = arith.constant 0 : index
      %c0_49 = arith.constant 0 : index
      %198 = vector.load %arg8[%c0_48, %c0_49] : memref<8x128xf32, #tpu.memory_space<vmem>>, vector<8x128xf32>
      tpu.vector_store %arg8[%c0_48, %c0_49], %197 {strides = array<i32>} : memref<8x128xf32, #tpu.memory_space<vmem>>, vector<8x128xf32>,
    } else {
    }
    %c0 = arith.constant 0 : index
    %c0_1 = arith.constant 0 : index
    %3 = vector.load %arg3[%c0, %c0_1] : memref<128x512xbf16, #tpu.memory_space<vmem>>, vector<128x512xbf16>
    %c0_2 = arith.constant 0 : index
    %c0_3 = arith.constant 0 : index
    %4 = vector.load %arg7[%c0_2, %c0_3] : memref<8x128xbf16, #tpu.memory_space<vmem>>, vector<8x128xbf16>
    %c0_4 = arith.constant 0 : index
    %c0_5 = arith.constant 0 : index
    %5 = vector.load %arg8[%c0_4, %c0_5] : memref<8x128xf32, #tpu.memory_space<vmem>>, vector<8x128xf32>
    %c0_i32_6 = arith.constant 0 : i32
    %cst = arith.constant dense<0.000000e+00> : vector<8x512xf32>
    %6 = tpu.matmul %4, %3, %cst {dimension_numbers = #tpu.dot_dimension_numbers<[1], [0], [0], [1], [0, 0, 1, 1], [], []>} : vector<8x128xbf16>, vector<128x512xbf16>, vector<8x512xf32> -> vector<8x512xf32>
    %7 = arith.index_cast %c0_i32_6 : i32 to index
    %c0_7 = arith.constant 0 : index
    %c0_8 = arith.constant 0 : index
    %8 = vector.load %arg2[%7, %c0_7, %c0_8] : memref<8x8x512xbf16, #tpu.memory_space<vmem>>, vector<1x8x512xbf16>
    %9 = vector.shape_cast %8 : vector<1x8x512xbf16> to vector<8x512xbf16>
    %10 = arith.extf %9 : vector<8x512xbf16> to vector<8x512xf32>
    %11 = arith.addf %6, %10 : vector<8x512xf32>
    %12 = vector.extract_strided_slice %11 {offsets = [0, 0], sizes = [8, 384], strides = [1, 1]} : vector<8x512xf32> to vector<8x384xf32>
    %13 = arith.negf %12 : vector<8x384xf32>
    %14 = math.exp %13 : vector<8x384xf32>
    %cst_9 = arith.constant 1.000000e+00 : f32
    %15 = vector.broadcast %cst_9 : f32 to vector<8x384xf32>
    %16 = arith.addf %15, %14 : vector<8x384xf32>
    %17 = arith.divf %15, %16 : vector<8x384xf32>
    %18 = vector.extract_strided_slice %17 {offsets = [0, 0], sizes = [8, 128], strides = [1, 1]} : vector<8x384xf32> to vector<8x128xf32>
    %19 = vector.extract_strided_slice %17 {offsets = [0, 128], sizes = [8, 128], strides = [1, 1]} : vector<8x384xf32> to vector<8x128xf32>
    %20 = vector.extract_strided_slice %17 {offsets = [0, 256], sizes = [8, 128], strides = [1, 1]} : vector<8x384xf32> to vector<8x128xf32>
    %21 = vector.extract_strided_slice %11 {offsets = [0, 384], sizes = [8, 128], strides = [1, 1]} : vector<8x512xf32> to vector<8x128xf32>
    %22 = math.tanh %21 : vector<8x128xf32>
    %23 = arith.mulf %19, %5 : vector<8x128xf32>
    %24 = arith.mulf %18, %22 : vector<8x128xf32>
    %25 = arith.addf %23, %24 : vector<8x128xf32>
    %26 = math.tanh %25 : vector<8x128xf32>
    %27 = arith.mulf %20, %26 : vector<8x128xf32>
    %28 = arith.truncf %27 : vector<8x128xf32> to vector<8x128xbf16>
    %c1_i32 = arith.constant 1 : i32
    %cst_10 = arith.constant dense<0.000000e+00> : vector<8x512xf32>
    %29 = tpu.matmul %28, %3, %cst_10 {dimension_numbers = #tpu.dot_dimension_numbers<[1], [0], [0], [1], [0, 0, 1, 1], [], []>} : vector<8x128xbf16>, vector<128x512xbf16>, vector<8x512xf32> -> vector<8x512xf32>
    %30 = arith.index_cast %c1_i32 : i32 to index
    %c0_11 = arith.constant 0 : index
    %c0_12 = arith.constant 0 : index
    %31 = vector.load %arg2[%30, %c0_11, %c0_12] : memref<8x8x512xbf16, #tpu.memory_space<vmem>>, vector<1x8x512xbf16>
    %32 = vector.shape_cast %31 : vector<1x8x512xbf16> to vector<8x512xbf16>
    %33 = arith.extf %32 : vector<8x512xbf16> to vector<8x512xf32>
    %34 = arith.addf %29, %33 : vector<8x512xf32>
    %35 = vector.extract_strided_slice %34 {offsets = [0, 0], sizes = [8, 384], strides = [1, 1]} : vector<8x512xf32> to vector<8x384xf32>
    %36 = arith.negf %35 : vector<8x384xf32>
    %37 = math.exp %36 : vector<8x384xf32>
    %cst_13 = arith.constant 1.000000e+00 : f32
    %38 = vector.broadcast %cst_13 : f32 to vector<8x384xf32>
    %39 = arith.addf %38, %37 : vector<8x384xf32>
    %40 = arith.divf %38, %39 : vector<8x384xf32>
    %41 = vector.extract_strided_slice %40 {offsets = [0, 0], sizes = [8, 128], strides = [1, 1]} : vector<8x384xf32> to vector<8x128xf32>
    %42 = vector.extract_strided_slice %40 {offsets = [0, 128], sizes = [8, 128], strides = [1, 1]} : vector<8x384xf32> to vector<8x128xf32>
    %43 = vector.extract_strided_slice %40 {offsets = [0, 256], sizes = [8, 128], strides = [1, 1]} : vector<8x384xf32> to vector<8x128xf32>
    %44 = vector.extract_strided_slice %34 {offsets = [0, 384], sizes = [8, 128], strides = [1, 1]} : vector<8x512xf32> to vector<8x128xf32>
    %45 = math.tanh %44 : vector<8x128xf32>
    %46 = arith.mulf %42, %25 : vector<8x128xf32>
    %47 = arith.mulf %41, %45 : vector<8x128xf32>
    %48 = arith.addf %46, %47 : vector<8x128xf32>
    %49 = math.tanh %48 : vector<8x128xf32>
    %50 = arith.mulf %43, %49 : vector<8x128xf32>
    %51 = arith.truncf %50 : vector<8x128xf32> to vector<8x128xbf16>
    %c2_i32 = arith.constant 2 : i32
    %cst_14 = arith.constant dense<0.000000e+00> : vector<8x512xf32>
    %52 = tpu.matmul %51, %3, %cst_14 {dimension_numbers = #tpu.dot_dimension_numbers<[1], [0], [0], [1], [0, 0, 1, 1], [], []>} : vector<8x128xbf16>, vector<128x512xbf16>, vector<8x512xf32> -> vector<8x512xf32>
    %53 = arith.index_cast %c2_i32 : i32 to index
    %c0_15 = arith.constant 0 : index
    %c0_16 = arith.constant 0 : index
    %54 = vector.load %arg2[%53, %c0_15, %c0_16] : memref<8x8x512xbf16, #tpu.memory_space<vmem>>, vector<1x8x512xbf16>
    %55 = vector.shape_cast %54 : vector<1x8x512xbf16> to vector<8x512xbf16>
    %56 = arith.extf %55 : vector<8x512xbf16> to vector<8x512xf32>
    %57 = arith.addf %52, %56 : vector<8x512xf32>
    %58 = vector.extract_strided_slice %57 {offsets = [0, 0], sizes = [8, 384], strides = [1, 1]} : vector<8x512xf32> to vector<8x384xf32>
    %59 = arith.negf %58 : vector<8x384xf32>
    %60 = math.exp %59 : vector<8x384xf32>
    %cst_17 = arith.constant 1.000000e+00 : f32
    %61 = vector.broadcast %cst_17 : f32 to vector<8x384xf32>
    %62 = arith.addf %61, %60 : vector<8x384xf32>
    %63 = arith.divf %61, %62 : vector<8x384xf32>
    %64 = vector.extract_strided_slice %63 {offsets = [0, 0], sizes = [8, 128], strides = [1, 1]} : vector<8x384xf32> to vector<8x128xf32>
    %65 = vector.extract_strided_slice %63 {offsets = [0, 128], sizes = [8, 128], strides = [1, 1]} : vector<8x384xf32> to vector<8x128xf32>
    %66 = vector.extract_strided_slice %63 {offsets = [0, 256], sizes = [8, 128], strides = [1, 1]} : vector<8x384xf32> to vector<8x128xf32>
    %67 = vector.extract_strided_slice %57 {offsets = [0, 384], sizes = [8, 128], strides = [1, 1]} : vector<8x512xf32> to vector<8x128xf32>
    %68 = math.tanh %67 : vector<8x128xf32>
    %69 = arith.mulf %65, %48 : vector<8x128xf32>
    %70 = arith.mulf %64, %68 : vector<8x128xf32>
    %71 = arith.addf %69, %70 : vector<8x128xf32>
    %72 = math.tanh %71 : vector<8x128xf32>
    %73 = arith.mulf %66, %72 : vector<8x128xf32>
    %74 = arith.truncf %73 : vector<8x128xf32> to vector<8x128xbf16>
    %c3_i32 = arith.constant 3 : i32
    %cst_18 = arith.constant dense<0.000000e+00> : vector<8x512xf32>
    %75 = tpu.matmul %74, %3, %cst_18 {dimension_numbers = #tpu.dot_dimension_numbers<[1], [0], [0], [1], [0, 0, 1, 1], [], []>} : vector<8x128xbf16>, vector<128x512xbf16>, vector<8x512xf32> -> vector<8x512xf32>
    %76 = arith.index_cast %c3_i32 : i32 to index
    %c0_19 = arith.constant 0 : index
    %c0_20 = arith.constant 0 : index
    %77 = vector.load %arg2[%76, %c0_19, %c0_20] : memref<8x8x512xbf16, #tpu.memory_space<vmem>>, vector<1x8x512xbf16>
    %78 = vector.shape_cast %77 : vector<1x8x512xbf16> to vector<8x512xbf16>
    %79 = arith.extf %78 : vector<8x512xbf16> to vector<8x512xf32>
    %80 = arith.addf %75, %79 : vector<8x512xf32>
    %81 = vector.extract_strided_slice %80 {offsets = [0, 0], sizes = [8, 384], strides = [1, 1]} : vector<8x512xf32> to vector<8x384xf32>
    %82 = arith.negf %81 : vector<8x384xf32>
    %83 = math.exp %82 : vector<8x384xf32>
    %cst_21 = arith.constant 1.000000e+00 : f32
    %84 = vector.broadcast %cst_21 : f32 to vector<8x384xf32>
    %85 = arith.addf %84, %83 : vector<8x384xf32>
    %86 = arith.divf %84, %85 : vector<8x384xf32>
    %87 = vector.extract_strided_slice %86 {offsets = [0, 0], sizes = [8, 128], strides = [1, 1]} : vector<8x384xf32> to vector<8x128xf32>
    %88 = vector.extract_strided_slice %86 {offsets = [0, 128], sizes = [8, 128], strides = [1, 1]} : vector<8x384xf32> to vector<8x128xf32>
    %89 = vector.extract_strided_slice %86 {offsets = [0, 256], sizes = [8, 128], strides = [1, 1]} : vector<8x384xf32> to vector<8x128xf32>
    %90 = vector.extract_strided_slice %80 {offsets = [0, 384], sizes = [8, 128], strides = [1, 1]} : vector<8x512xf32> to vector<8x128xf32>
    %91 = math.tanh %90 : vector<8x128xf32>
    %92 = arith.mulf %88, %71 : vector<8x128xf32>
    %93 = arith.mulf %87, %91 : vector<8x128xf32>
    %94 = arith.addf %92, %93 : vector<8x128xf32>
    %95 = math.tanh %94 : vector<8x128xf32>
    %96 = arith.mulf %89, %95 : vector<8x128xf32>
    %97 = arith.truncf %96 : vector<8x128xf32> to vector<8x128xbf16>
    %c4_i32 = arith.constant 4 : i32
    %cst_22 = arith.constant dense<0.000000e+00> : vector<8x512xf32>
    %98 = tpu.matmul %97, %3, %cst_22 {dimension_numbers = #tpu.dot_dimension_numbers<[1], [0], [0], [1], [0, 0, 1, 1], [], []>} : vector<8x128xbf16>, vector<128x512xbf16>, vector<8x512xf32> -> vector<8x512xf32>
    %99 = arith.index_cast %c4_i32 : i32 to index
    %c0_23 = arith.constant 0 : index
    %c0_24 = arith.constant 0 : index
    %100 = vector.load %arg2[%99, %c0_23, %c0_24] : memref<8x8x512xbf16, #tpu.memory_space<vmem>>, vector<1x8x512xbf16>
    %101 = vector.shape_cast %100 : vector<1x8x512xbf16> to vector<8x512xbf16>
    %102 = arith.extf %101 : vector<8x512xbf16> to vector<8x512xf32>
    %103 = arith.addf %98, %102 : vector<8x512xf32>
    %104 = vector.extract_strided_slice %103 {offsets = [0, 0], sizes = [8, 384], strides = [1, 1]} : vector<8x512xf32> to vector<8x384xf32>
    %105 = arith.negf %104 : vector<8x384xf32>
    %106 = math.exp %105 : vector<8x384xf32>
    %cst_25 = arith.constant 1.000000e+00 : f32
    %107 = vector.broadcast %cst_25 : f32 to vector<8x384xf32>
    %108 = arith.addf %107, %106 : vector<8x384xf32>
    %109 = arith.divf %107, %108 : vector<8x384xf32>
    %110 = vector.extract_strided_slice %109 {offsets = [0, 0], sizes = [8, 128], strides = [1, 1]} : vector<8x384xf32> to vector<8x128xf32>
    %111 = vector.extract_strided_slice %109 {offsets = [0, 128], sizes = [8, 128], strides = [1, 1]} : vector<8x384xf32> to vector<8x128xf32>
    %112 = vector.extract_strided_slice %109 {offsets = [0, 256], sizes = [8, 128], strides = [1, 1]} : vector<8x384xf32> to vector<8x128xf32>
    %113 = vector.extract_strided_slice %103 {offsets = [0, 384], sizes = [8, 128], strides = [1, 1]} : vector<8x512xf32> to vector<8x128xf32>
    %114 = math.tanh %113 : vector<8x128xf32>
    %115 = arith.mulf %111, %94 : vector<8x128xf32>
    %116 = arith.mulf %110, %114 : vector<8x128xf32>
    %117 = arith.addf %115, %116 : vector<8x128xf32>
    %118 = math.tanh %117 : vector<8x128xf32>
    %119 = arith.mulf %112, %118 : vector<8x128xf32>
    %120 = arith.truncf %119 : vector<8x128xf32> to vector<8x128xbf16>
    %c5_i32 = arith.constant 5 : i32
    %cst_26 = arith.constant dense<0.000000e+00> : vector<8x512xf32>
    %121 = tpu.matmul %120, %3, %cst_26 {dimension_numbers = #tpu.dot_dimension_numbers<[1], [0], [0], [1], [0, 0, 1, 1], [], []>} : vector<8x128xbf16>, vector<128x512xbf16>, vector<8x512xf32> -> vector<8x512xf32>
    %122 = arith.index_cast %c5_i32 : i32 to index
    %c0_27 = arith.constant 0 : index
    %c0_28 = arith.constant 0 : index
    %123 = vector.load %arg2[%122, %c0_27, %c0_28] : memref<8x8x512xbf16, #tpu.memory_space<vmem>>, vector<1x8x512xbf16>
    %124 = vector.shape_cast %123 : vector<1x8x512xbf16> to vector<8x512xbf16>
    %125 = arith.extf %124 : vector<8x512xbf16> to vector<8x512xf32>
    %126 = arith.addf %121, %125 : vector<8x512xf32>
    %127 = vector.extract_strided_slice %126 {offsets = [0, 0], sizes = [8, 384], strides = [1, 1]} : vector<8x512xf32> to vector<8x384xf32>
    %128 = arith.negf %127 : vector<8x384xf32>
    %129 = math.exp %128 : vector<8x384xf32>
    %cst_29 = arith.constant 1.000000e+00 : f32
    %130 = vector.broadcast %cst_29 : f32 to vector<8x384xf32>
    %131 = arith.addf %130, %129 : vector<8x384xf32>
    %132 = arith.divf %130, %131 : vector<8x384xf32>
    %133 = vector.extract_strided_slice %132 {offsets = [0, 0], sizes = [8, 128], strides = [1, 1]} : vector<8x384xf32> to vector<8x128xf32>
    %134 = vector.extract_strided_slice %132 {offsets = [0, 128], sizes = [8, 128], strides = [1, 1]} : vector<8x384xf32> to vector<8x128xf32>
    %135 = vector.extract_strided_slice %132 {offsets = [0, 256], sizes = [8, 128], strides = [1, 1]} : vector<8x384xf32> to vector<8x128xf32>
    %136 = vector.extract_strided_slice %126 {offsets = [0, 384], sizes = [8, 128], strides = [1, 1]} : vector<8x512xf32> to vector<8x128xf32>
    %137 = math.tanh %136 : vector<8x128xf32>
    %138 = arith.mulf %134, %117 : vector<8x128xf32>
    %139 = arith.mulf %133, %137 : vector<8x128xf32>
    %140 = arith.addf %138, %139 : vector<8x128xf32>
    %141 = math.tanh %140 : vector<8x128xf32>
    %142 = arith.mulf %135, %141 : vector<8x128xf32>
    %143 = arith.truncf %142 : vector<8x128xf32> to vector<8x128xbf16>
    %c6_i32 = arith.constant 6 : i32
    %cst_30 = arith.constant dense<0.000000e+00> : vector<8x512xf32>
    %144 = tpu.matmul %143, %3, %cst_30 {dimension_numbers = #tpu.dot_dimension_numbers<[1], [0], [0], [1], [0, 0, 1, 1], [], []>} : vector<8x128xbf16>, vector<128x512xbf16>, vector<8x512xf32> -> vector<8x512xf32>
    %145 = arith.index_cast %c6_i32 : i32 to index
    %c0_31 = arith.constant 0 : index
    %c0_32 = arith.constant 0 : index
    %146 = vector.load %arg2[%145, %c0_31, %c0_32] : memref<8x8x512xbf16, #tpu.memory_space<vmem>>, vector<1x8x512xbf16>
    %147 = vector.shape_cast %146 : vector<1x8x512xbf16> to vector<8x512xbf16>
    %148 = arith.extf %147 : vector<8x512xbf16> to vector<8x512xf32>
    %149 = arith.addf %144, %148 : vector<8x512xf32>
    %150 = vector.extract_strided_slice %149 {offsets = [0, 0], sizes = [8, 384], strides = [1, 1]} : vector<8x512xf32> to vector<8x384xf32>
    %151 = arith.negf %150 : vector<8x384xf32>
    %152 = math.exp %151 : vector<8x384xf32>
    %cst_33 = arith.constant 1.000000e+00 : f32
    %153 = vector.broadcast %cst_33 : f32 to vector<8x384xf32>
    %154 = arith.addf %153, %152 : vector<8x384xf32>
    %155 = arith.divf %153, %154 : vector<8x384xf32>
    %156 = vector.extract_strided_slice %155 {offsets = [0, 0], sizes = [8, 128], strides = [1, 1]} : vector<8x384xf32> to vector<8x128xf32>
    %157 = vector.extract_strided_slice %155 {offsets = [0, 128], sizes = [8, 128], strides = [1, 1]} : vector<8x384xf32> to vector<8x128xf32>
    %158 = vector.extract_strided_slice %155 {offsets = [0, 256], sizes = [8, 128], strides = [1, 1]} : vector<8x384xf32> to vector<8x128xf32>
    %159 = vector.extract_strided_slice %149 {offsets = [0, 384], sizes = [8, 128], strides = [1, 1]} : vector<8x512xf32> to vector<8x128xf32>
    %160 = math.tanh %159 : vector<8x128xf32>
    %161 = arith.mulf %157, %140 : vector<8x128xf32>
    %162 = arith.mulf %156, %160 : vector<8x128xf32>
    %163 = arith.addf %161, %162 : vector<8x128xf32>
    %164 = math.tanh %163 : vector<8x128xf32>
    %165 = arith.mulf %158, %164 : vector<8x128xf32>
    %166 = arith.truncf %165 : vector<8x128xf32> to vector<8x128xbf16>
    %c7_i32 = arith.constant 7 : i32
    %cst_34 = arith.constant dense<0.000000e+00> : vector<8x512xf32>
    %167 = tpu.matmul %166, %3, %cst_34 {dimension_numbers = #tpu.dot_dimension_numbers<[1], [0], [0], [1], [0, 0, 1, 1], [], []>} : vector<8x128xbf16>, vector<128x512xbf16>, vector<8x512xf32> -> vector<8x512xf32>
    %168 = arith.index_cast %c7_i32 : i32 to index
    %c0_35 = arith.constant 0 : index
    %c0_36 = arith.constant 0 : index
    %169 = vector.load %arg2[%168, %c0_35, %c0_36] : memref<8x8x512xbf16, #tpu.memory_space<vmem>>, vector<1x8x512xbf16>
    %170 = vector.shape_cast %169 : vector<1x8x512xbf16> to vector<8x512xbf16>
    %171 = arith.extf %170 : vector<8x512xbf16> to vector<8x512xf32>
    %172 = arith.addf %167, %171 : vector<8x512xf32>
    %173 = vector.extract_strided_slice %172 {offsets = [0, 0], sizes = [8, 384], strides = [1, 1]} : vector<8x512xf32> to vector<8x384xf32>
    %174 = arith.negf %173 : vector<8x384xf32>
    %175 = math.exp %174 : vector<8x384xf32>
    %cst_37 = arith.constant 1.000000e+00 : f32
    %176 = vector.broadcast %cst_37 : f32 to vector<8x384xf32>
    %177 = arith.addf %176, %175 : vector<8x384xf32>
    %178 = arith.divf %176, %177 : vector<8x384xf32>
    %179 = vector.extract_strided_slice %178 {offsets = [0, 0], sizes = [8, 128], strides = [1, 1]} : vector<8x384xf32> to vector<8x128xf32>
    %180 = vector.extract_strided_slice %178 {offsets = [0, 128], sizes = [8, 128], strides = [1, 1]} : vector<8x384xf32> to vector<8x128xf32>
    %181 = vector.extract_strided_slice %178 {offsets = [0, 256], sizes = [8, 128], strides = [1, 1]} : vector<8x384xf32> to vector<8x128xf32>
    %182 = vector.extract_strided_slice %172 {offsets = [0, 384], sizes = [8, 128], strides = [1, 1]} : vector<8x512xf32> to vector<8x128xf32>
    %183 = math.tanh %182 : vector<8x128xf32>
    %184 = arith.mulf %180, %163 : vector<8x128xf32>
    %185 = arith.mulf %179, %183 : vector<8x128xf32>
    %186 = arith.addf %184, %185 : vector<8x128xf32>
    %187 = math.tanh %186 : vector<8x128xf32>
    %188 = arith.mulf %181, %187 : vector<8x128xf32>
    %189 = arith.truncf %188 : vector<8x128xf32> to vector<8x128xbf16>
    %c8_i32 = arith.constant 8 : i32
    %c0_38 = arith.constant 0 : index
    %c0_39 = arith.constant 0 : index
    %190 = vector.load %arg7[%c0_38, %c0_39] : memref<8x128xbf16, #tpu.memory_space<vmem>>, vector<8x128xbf16>
    tpu.vector_store %arg7[%c0_38, %c0_39], %189 {strides = array<i32>} : memref<8x128xbf16, #tpu.memory_space<vmem>>, vector<8x128xbf16>,
    %c0_40 = arith.constant 0 : index
    %c0_41 = arith.constant 0 : index
    %191 = vector.load %arg8[%c0_40, %c0_41] : memref<8x128xf32, #tpu.memory_space<vmem>>, vector<8x128xf32>
    tpu.vector_store %arg8[%c0_40, %c0_41], %186 {strides = array<i32>} : memref<8x128xf32, #tpu.memory_space<vmem>>, vector<8x128xf32>,
    %c0_i32_42 = arith.constant 0 : i32
    %192 = arith.cmpi eq, %arg1, %c0_i32_42 : i32
    %193 = arith.extui %192 : i1 to i32
    %c0_i32_43 = arith.constant 0 : i32
    %194 = arith.cmpi ne, %193, %c0_i32_43 : i32
    scf.if %194 {
      %195 = arith.extf %189 : vector<8x128xbf16> to vector<8x128xf32>
      %c0_44 = arith.constant 0 : index
      %c0_45 = arith.constant 0 : index
      %196 = vector.load %arg4[%c0_44, %c0_45] : memref<128x128xf32, #tpu.memory_space<vmem>>, vector<128x128xf32>
      %cst_46 = arith.constant dense<0.000000e+00> : vector<8x128xf32>
      %197 = tpu.matmul %195, %196, %cst_46 {dimension_numbers = #tpu.dot_dimension_numbers<[1], [0], [0], [1], [0, 0, 1, 1], [], []>} : vector<8x128xf32>, vector<128x128xf32>, vector<8x128xf32> -> vector<8x128xf32>
      %c0_47 = arith.constant 0 : index
      %c0_48 = arith.constant 0 : index
      %198 = vector.load %arg5[%c0_47, %c0_48] : memref<1x128xf32, #tpu.memory_space<vmem>>, vector<1x128xf32>
      %199 = vector.broadcast %198 : vector<1x128xf32> to vector<8x128xf32>
      %200 = arith.addf %197, %199 : vector<8x128xf32>
      %201 = arith.negf %200 : vector<8x128xf32>
      %202 = math.exp %201 : vector<8x128xf32>
      %cst_49 = arith.constant 1.000000e+00 : f32
      %203 = vector.broadcast %cst_49 : f32 to vector<8x128xf32>
      %204 = arith.addf %203, %202 : vector<8x128xf32>
      %205 = arith.divf %203, %204 : vector<8x128xf32>
      %c0_50 = arith.constant 0 : index
      %c0_51 = arith.constant 0 : index
      %206 = vector.load %arg6[%c0_50, %c0_51] : memref<8x128xf32, #tpu.memory_space<vmem>>, vector<8x128xf32>
      tpu.vector_store %arg6[%c0_50, %c0_51], %205 {strides = array<i32>} : memref<8x128xf32, #tpu.memory_space<vmem>>, vector<8x128xf32>,
    } else {
    }
    return
  }
  func.func @transform_0(%arg0: i32, %arg1: i32) -> (i32, i32, i32) {
    %c0_i32 = arith.constant 0 : i32
    %c0_i32_0 = arith.constant 0 : i32
    return %arg1, %arg0, %c0_i32 : i32, i32, i32
  }
  func.func @transform_1(%arg0: i32, %arg1: i32) -> (i32, i32) {
    %c0_i32 = arith.constant 0 : i32
    %c0_i32_0 = arith.constant 0 : i32
    %c0_i32_1 = arith.constant 0 : i32
    return %c0_i32, %c0_i32_0 : i32, i32
  }
  func.func @transform_2(%arg0: i32, %arg1: i32) -> (i32, i32) {
    %c0_i32 = arith.constant 0 : i32
    %c0_i32_0 = arith.constant 0 : i32
    %c0_i32_1 = arith.constant 0 : i32
    return %c0_i32, %c0_i32_0 : i32, i32
  }
  func.func @transform_3(%arg0: i32, %arg1: i32) -> (i32, i32) {
    %c0_i32 = arith.constant 0 : i32
    %c0_i32_0 = arith.constant 0 : i32
    %c0_i32_1 = arith.constant 0 : i32
    return %c0_i32, %c0_i32_0 : i32, i32
  }
  func.func @transform_4(%arg0: i32, %arg1: i32) -> (i32, i32) {
    %c0_i32 = arith.constant 0 : i32
    %c0_i32_0 = arith.constant 0 : i32
    return %arg0, %c0_i32 : i32, i32
  }
}

</mosaic_0001>

<bundles_post_ra>
// kernel: tpu_custom_call.1
= control target key start
LH: loop header
LB: loop body
LE: loop exit
PB: predicated region body
PF: predicated region fallthrough
CT: control target
= control target key end

     0   :  { %9 = vsyncpa [#allocation5], 0  ;;  %s2096_s0 = inlined_call_operand.hbm [shape: bf16[8,8,512], index: 0, kind: input, shape index: {}]   ;;  %s2097_s1 = inlined_call_operand.hbm [shape: bf16[128,512], index: 1, kind: input, shape index: {}]   ;;  %s2098_s2 = inlined_call_operand.hbm [shape: f32[128,128], index: 2, kind: input, shape index: {}]   ;;  %s2099_s3 = inlined_call_operand.vmem [shape: f32[1,128], index: 3, kind: input, shape index: {}]   ;;  %s2100_s4 = inlined_call_operand.hbm [shape: f32[8,128], index: 4, kind: output, shape index: {}]  }
   0x1   :  { %10 = vsyncpa [#allocation8], 0 }
   0x2   :  { %11 = vsyncpa [#allocation6], 0  ;;  %s1712_s15 = smov [#allocation7]   ;;  %s1713_s17 = smov [#allocation4]  }
   0x3   :  { %s29_s16 = sshll.u32 %s1712_s15, 4  ;;  %s17_s18 = sshll.u32 %s1713_s17, 4  ;;  %s30_s16 = int_to_ptr.vmem [resolvable:$true] %s29_s16  ;;  %s18_s18 = int_to_ptr.vmem [resolvable:$true] %s17_s18 }
   0x4   :  { %s1634_s19 = scalar_lea.vmem %s30_s16, 4096  ;;  %p1639_p1 = scmp.lt.s32.totalorder %s30_s16, %s30_s16 }
   0x5   :  { %p1635_p0 = scmp.ne.s32.totalorder %s30_s16, %s1634_s19  ;;  %p1640_p2 = scmp.lt.s32.totalorder %s1634_s19, %s1634_s19 }
   0x7   :  { %p1641_p3 = por %p1640_p2, %p1639_p1 }
   0x9   :  { %p1642_p4 = pnand %p1641_p3, %p1635_p0 }
   0xb   :  { %1645 = shalt.err (!%p1642_p4)
}
   0xc   :  { %s1714_s20 = smov 256   ;;  %s1715_s21 = smov 16  }
   0xd   :  { %35 = dma.hbm_to_vmem [thread:$0]  %s2097_s1, 4096, %s30_s16, [#allocation8], %s1714_s20, %s1714_s20, %s1715_s21  }
   0xe   :  { %s1654_s24 = scalar_lea.vmem %s18_s18, 2048  ;;  %p1659_p6 = scmp.lt.s32.totalorder %s18_s18, %s18_s18 }
   0xf   :  { %p1655_p5 = scmp.ne.s32.totalorder %s18_s18, %s1654_s24  ;;  %p1660_p7 = scmp.lt.s32.totalorder %s1654_s24, %s1654_s24 }
  0x11   :  { %p1661_p8 = por %p1660_p7, %p1659_p6 }
  0x13   :  { %p1662_p9 = pnand %p1661_p8, %p1655_p5 }
  0x15   :  { %1665 = shalt.err (!%p1662_p9)
}
  0x16   :  { %23 = dma.hbm_to_vmem [thread:$0]  %s2096_s0, 2048, %s18_s18, [#allocation5], %s1714_s20, %s1714_s20, %s1715_s21  }
  0x17   :  { %s1716_s27 = smov [#allocation9]  }
  0x18   :  { %s41_s28 = sshll.u32 %s1716_s27, 4  ;;  %s42_s28 = int_to_ptr.vmem [resolvable:$true] %s41_s28 }
  0x19   :  { %s1674_s29 = scalar_lea.vmem %s42_s28, 2048  ;;  %p1679_p11 = scmp.lt.s32.totalorder %s42_s28, %s42_s28 }
  0x1a   :  { %p1675_p10 = scmp.ne.s32.totalorder %s42_s28, %s1674_s29  ;;  %p1680_p12 = scmp.lt.s32.totalorder %s1674_s29, %s1674_s29 }
  0x1c   :  { %p1681_p13 = por %p1680_p12, %p1679_p11 }
  0x1e   :  { %p1682_p0 = pnand %p1681_p13, %p1675_p10 }
  0x20   :  { %1685 = shalt.err (!%p1682_p0)
}
  0x21   :  { %s1717_s1 = smov 128   ;;  %s1718_s30 = smov 8  }
  0x22   :  { %47 = dma.hbm_to_vmem [thread:$0]  %s2098_s2, 2048, %s42_s28, [#allocation8], %s1717_s1, %s1717_s1, %s1718_s30  }
  0x23   :  { %1706 = dma.done.wait [#allocation5], 2048  }
  0x24   :  { %1707 = vsyncadd [#allocation5], 4294965248 }
  0x25   :  { %1708 = dma.done.wait [#allocation8], 6144  }
  0x26   :  { %1709 = vsyncadd [#allocation8], 4294961152  ;;  %v1719_v0 = vmov 0   ;;  %v1760_v1 = vld [vmem:[#allocation7 + $0xe4] ss:$16 sps:$4 sm:$0xff]   ;;  %v101_v43 = vld [vmem:[#allocation4 + $0x8] sm:$0xff] }
  0x27   :  { %298 = vmatprep.mubr.bf16.mxu0 %v1719_v0  ;;  %64 = vst [vmem:[#allocation2] sm:$0xf] %v1719_v0  ;;  %339 = vmatprep.mubr.bf16.mxu1 %v1719_v0  ;;  %v1762_v2 = vld [vmem:[#allocation7 + $0xe0] ss:$16 sps:$4 sm:$0xff]   ;;  %v1765_v3 = vld [vmem:[#allocation7 + $0xc4] ss:$16 sps:$4 sm:$0xff]   ;;  %v104_v47 = vunpack.c.l.bf16 %v101_v43  ;;  %v105_v52 = vunpack.c.h.bf16 %v101_v43 }
  0x28   :  { %266 = vmatprep.subr.bf16.mxu0 %v1760_v1  ;;  %v1768_v4 = vld [vmem:[#allocation7 + $0xc0] ss:$16 sps:$4 sm:$0xff]   ;;  %v1771_v5 = vld [vmem:[#allocation7 + $0xa4] ss:$16 sps:$4 sm:$0xff]   ;;  %v1773_v6 = vld [vmem:[#allocation7 + $0xec] ss:$16 sps:$4 sm:$0xff]  }
  0x29   :  { %267 = vmatpush1.bf16.msra.mxu0 %v1762_v2  ;;  %v1775_v7 = vld [vmem:[#allocation7 + $0xe8] ss:$16 sps:$4 sm:$0xff]   ;;  %v1778_v8 = vld [vmem:[#allocation7 + $0xa0] ss:$16 sps:$4 sm:$0xff]   ;;  %307 = vmatprep.subr.bf16.mxu1 %v1773_v6  ;;  %v1782_v9 = vld [vmem:[#allocation7 + $0x84] ss:$16 sps:$4 sm:$0xff]  }
  0x2a   :  { %268 = vmatprep.subr.bf16.mxu0 %v1765_v3  ;;  %308 = vmatpush1.bf16.msra.mxu1 %v1775_v7  ;;  %v1785_v10 = vld [vmem:[#allocation7 + $0xcc] ss:$16 sps:$4 sm:$0xff]   ;;  %v1787_v11 = vld [vmem:[#allocation7 + $0xc8] ss:$16 sps:$4 sm:$0xff]   ;;  %v1791_v12 = vld [vmem:[#allocation7 + $0x80] ss:$16 sps:$4 sm:$0xff]  }
  0x2b   :  { %309 = vmatprep.subr.bf16.mxu1 %v1785_v10  ;;  %v1793_v13 = vld [vmem:[#allocation7 + $0x64] ss:$16 sps:$4 sm:$0xff]   ;;  %v1795_v14 = vld [vmem:[#allocation7 + $0xac] ss:$16 sps:$4 sm:$0xff]   ;;  %v1799_v15 = vld [vmem:[#allocation7 + $0xa8] ss:$16 sps:$4 sm:$0xff]  }
  0x2c   :  { %v1802_v16 = vld [vmem:[#allocation7 + $0x8c] ss:$16 sps:$4 sm:$0xff]   ;;  %v1805_v17 = vld [vmem:[#allocation7 + $0x60] ss:$16 sps:$4 sm:$0xff]   ;;  %v1808_v18 = vld [vmem:[#allocation7 + $0x44] ss:$16 sps:$4 sm:$0xff]  }
  0x2d   :  { %269 = vmatpush1.bf16.msra.mxu0 %v1768_v4  ;;  %v1811_v19 = vld [vmem:[#allocation7 + $0x88] ss:$16 sps:$4 sm:$0xff]   ;;  %v1814_v20 = vld [vmem:[#allocation7 + $0x6c] ss:$16 sps:$4 sm:$0xff]   ;;  %v1816_v21 = vld [vmem:[#allocation7 + $0x40] ss:$16 sps:$4 sm:$0xff]  }
  0x2e   :  { %270 = vmatprep.subr.bf16.mxu0 %v1771_v5  ;;  %310 = vmatpush1.bf16.msra.mxu1 %v1787_v11  ;;  %v1819_v22 = vld [vmem:[#allocation7 + $0x24] ss:$16 sps:$4 sm:$0xff]   ;;  %v1823_v23 = vld [vmem:[#allocation7 + $0x68] ss:$16 sps:$4 sm:$0xff]   ;;  %v1826_v24 = vld [vmem:[#allocation7 + $0x4c] ss:$16 sps:$4 sm:$0xff]  }
  0x2f   :  { %311 = vmatprep.subr.bf16.mxu1 %v1795_v14  ;;  %v1829_v25 = vld [vmem:[#allocation7 + $0x20] ss:$16 sps:$4 sm:$0xff]   ;;  %v1832_v26 = vld [vmem:[#allocation7 + $0x4] ss:$16 sps:$4 sm:$0xff]   ;;  %v1835_v27 = vld [vmem:[#allocation7 + $0x48] ss:$16 sps:$4 sm:$0xff]  }
  0x30   :  { %v1838_v28 = vld [vmem:[#allocation7 + $0x2c] ss:$16 sps:$4 sm:$0xff]   ;;  %v1841_v29 = vld [vmem:[#allocation7] ss:$16 sps:$4 sm:$0xff]   ;;  %v1845_v30 = vld [vmem:[#allocation7 + $0x28] ss:$16 sps:$4 sm:$0xff]  }
  0x31   :  { %271 = vmatpush1.bf16.msra.mxu0 %v1778_v8  ;;  %v1848_v31 = vld [vmem:[#allocation7 + $0xc] ss:$16 sps:$4 sm:$0xff]   ;;  %v1852_v33 = vld [vmem:[#allocation7 + $0x8] ss:$16 sps:$4 sm:$0xff]   ;;  %v100_v34 = vld [vmem:[#allocation4] sm:$0xff]  ;;  %vm1721_vm0 = vmmov 0  }
  0x32   :  { %272 = vmatprep.subr.bf16.mxu0 %v1782_v9  ;;  %312 = vmatpush1.bf16.msra.mxu1 %v1799_v15  ;;  %v98_v32 = vld [vmem:[#allocation2] sm:$0xf]  ;;  %v102_v35 = vunpack.c.l.bf16 %v100_v34  ;;  %v103_v36 = vunpack.c.h.bf16 %v100_v34  ;;  %s1722_s7 = smov [#allocation10]  }
  0x33   :  { %313 = vmatprep.subr.bf16.mxu1 %v1802_v16  ;;  %s1283_s8 = sshll.u32 %s1722_s7, 4  ;;  %s1284_s8 = int_to_ptr.vmem [resolvable:$true] %s1283_s8 }
  0x34   :  { %s1686_s9 = scalar_lea.vmem %s1284_s8, 128  ;;  %p1691_p2 = scmp.lt.s32.totalorder %s1284_s8, %s1284_s8 }
  0x35   :  { %273 = vmatpush1.bf16.msra.mxu0 %v1791_v12  ;;  %p1687_p1 = scmp.ne.s32.totalorder %s1284_s8, %s1686_s9  ;;  %p1692_p3 = scmp.lt.s32.totalorder %s1686_s9, %s1686_s9 }
  0x36   :  { %274 = vmatprep.subr.bf16.mxu0 %v1793_v13  ;;  %314 = vmatpush1.bf16.msra.mxu1 %v1811_v19 }
  0x37   :  { %315 = vmatprep.subr.bf16.mxu1 %v1814_v20  ;;  %p1693_p4 = por %p1692_p3, %p1691_p2 }
  0x39   :  { %275 = vmatpush1.bf16.msra.mxu0 %v1805_v17  ;;  %p1694_p5 = pnand %p1693_p4, %p1687_p1 }
  0x3a   :  { %276 = vmatprep.subr.bf16.mxu0 %v1808_v18  ;;  %316 = vmatpush1.bf16.msra.mxu1 %v1823_v23 }
  0x3b   :  { %317 = vmatprep.subr.bf16.mxu1 %v1826_v24 }
  0x3d   :  { %277 = vmatpush1.bf16.msra.mxu0 %v1816_v21 }
  0x3e   :  { %278 = vmatprep.subr.bf16.mxu0 %v1819_v22  ;;  %318 = vmatpush1.bf16.msra.mxu1 %v1835_v27 }
  0x3f   :  { %319 = vmatprep.subr.bf16.mxu1 %v1838_v28 }
  0x41   :  { %279 = vmatpush1.bf16.msra.mxu0 %v1829_v25 }
  0x42   :  { %280 = vmatprep.subr.bf16.mxu0 %v1832_v26  ;;  %320 = vmatpush1.bf16.msra.mxu1 %v1845_v30 }
  0x43   :  { %321 = vmatprep.subr.bf16.mxu1 %v1848_v31 }
  0x45   :  { %281 = vmatpush1.bf16.msra.mxu0 %v1841_v29 }
  0x46   :  { %380 = vmatprep.subr.bf16.mxu0 %v1760_v1  ;;  %322 = vmatpush1.bf16.msra.mxu1 %v1852_v33 }
  0x47   :  { %421 = vmatprep.subr.bf16.mxu1 %v1773_v6 }
  0x48   :  { %299 = vmatmul.mubr.bf16.vlgmr.msra.gmra.mxu0 %v98_v32 }
  0x49   :  { %381 = vmatpush1.bf16.msra.mxu0 %v1762_v2  ;;  %412 = vmatprep.mubr.bf16.mxu0 %v1719_v0 }
  0x4a   :  { %382 = vmatprep.subr.bf16.mxu0 %v1765_v3  ;;  %340 = vmatmul.mubr.bf16.vlgmr.msra.gmra.mxu1 %v98_v32 }
  0x4b   :  { %422 = vmatpush1.bf16.msra.mxu1 %v1775_v7  ;;  %453 = vmatprep.mubr.bf16.mxu1 %v1719_v0 }
  0x4c   :  { %423 = vmatprep.subr.bf16.mxu1 %v1785_v10 }
  0x4d   :  { %383 = vmatpush1.bf16.msra.mxu0 %v1768_v4 }
  0x4e   :  { %384 = vmatprep.subr.bf16.mxu0 %v1771_v5 }
  0x4f   :  { %424 = vmatpush1.bf16.msra.mxu1 %v1787_v11 }
  0x50   :  { %425 = vmatprep.subr.bf16.mxu1 %v1795_v14 }
  0x51   :  { %385 = vmatpush1.bf16.msra.mxu0 %v1778_v8 }
  0x52   :  { %386 = vmatprep.subr.bf16.mxu0 %v1782_v9 }
  0x53   :  { %426 = vmatpush1.bf16.msra.mxu1 %v1799_v15 }
  0x54   :  { %427 = vmatprep.subr.bf16.mxu1 %v1802_v16 }
  0x55   :  { %387 = vmatpush1.bf16.msra.mxu0 %v1791_v12 }
  0x56   :  { %388 = vmatprep.subr.bf16.mxu0 %v1793_v13 }
  0x57   :  { %428 = vmatpush1.bf16.msra.mxu1 %v1811_v19 }
  0x58   :  { %429 = vmatprep.subr.bf16.mxu1 %v1814_v20 }
  0x59   :  { %389 = vmatpush1.bf16.msra.mxu0 %v1805_v17 }
  0x5a   :  { %390 = vmatprep.subr.bf16.mxu0 %v1808_v18 }
  0x5b   :  { %430 = vmatpush1.bf16.msra.mxu1 %v1823_v23 }
  0x5c   :  { %431 = vmatprep.subr.bf16.mxu1 %v1826_v24 }
  0x5d   :  { %391 = vmatpush1.bf16.msra.mxu0 %v1816_v21 }
  0x5e   :  { %392 = vmatprep.subr.bf16.mxu0 %v1819_v22 }
  0x5f   :  { %432 = vmatpush1.bf16.msra.mxu1 %v1835_v27 }
  0x60   :  { %433 = vmatprep.subr.bf16.mxu1 %v1838_v28 }
  0x61   :  { %393 = vmatpush1.bf16.msra.mxu0 %v1829_v25 }
  0x62   :  { %394 = vmatprep.subr.bf16.mxu0 %v1832_v26 }
  0x63   :  { %434 = vmatpush1.bf16.msra.mxu1 %v1845_v30 }
  0x64   :  { %435 = vmatprep.subr.bf16.mxu1 %v1848_v31 }
  0x65   :  { %395 = vmatpush1.bf16.msra.mxu0 %v1841_v29 }
  0x66   :  { %494 = vmatprep.subr.bf16.mxu0 %v1760_v1 }
  0x67   :  { %436 = vmatpush1.bf16.msra.mxu1 %v1852_v33 }
  0x68   :  { %535 = vmatprep.subr.bf16.mxu1 %v1773_v6 }
 0x108   :  { %v300_v37 = vpop.f32.mrf.mxu0 }
 0x109   :  { %v301_v38 = vadd.f32 %v300_v37, %v102_v35 }
 0x10a   :  { %v302_v39 = vpop.f32.mrf.mxu0  ;;  %v341_v45 = vpop.f32.mrf.mxu1 }
 0x10b   :  { %v1325_v40 = vmul.f32 -1.442695, %v301_v38  ;;  %v303_v41 = vadd.f32 %v302_v39, %v103_v36  ;;  %v342_v50 = vadd.f32 %v341_v45, %v104_v47 }
 0x10c   :  { %v304_v42 = vpop.f32.mrf.mxu0  ;;  %v343_v48 = vpop.f32.mrf.mxu1 }
 0x10d   :  { %1462 = vpow2.f32 %v1325_v40  ;;  %v1326_v44 = vmul.f32 -1.442695, %v303_v41  ;;  %v1327_v53 = vmul.f32 -1.442695, %v342_v50  ;;  %v344_v54 = vadd.f32 %v343_v48, %v105_v52  ;;  %v374_v40 = vld [vmem:[#allocation4 + $0x10] sm:$0xff]  ;;  %v375_v52 = vld [vmem:[#allocation4 + $0x18] sm:$0xff] }
 0x10e   :  { %v305_v46 = vpop.f32.mrf.mxu0  ;;  %v345_v49 = vpop.f32.mrf.mxu1  ;;  %v376_v41 = vunpack.c.l.bf16 %v374_v40  ;;  %v377_v42 = vunpack.c.h.bf16 %v374_v40 }
 0x10f   :  { %1464 = vpow2.f32 %v1326_v44 }
 0x110   :  { %v346_v51 = vpop.f32.mrf.mxu1  ;;  %1466 = vpow2.f32 %v1327_v53 }
 0x111   :  { %1468 = vtanh.f32 %v344_v54 }
 0x11a   :  { %v1463_v55 = vpop.eup %1462 }
 0x11b   :  { %v357_v56 = vadd.f32 1.0, %v1463_v55 }
 0x11c   :  { %v1465_v57 = vpop.eup %1464 }
 0x11d   :  { %1470 = vrcp.f32 %v357_v56  ;;  %v358_v58 = vadd.f32 1.0, %v1465_v57  ;;  %v1467_v59 = vpop.eup %1466  ;;  %v378_v56 = vunpack.c.l.bf16 %v375_v52 }
 0x11e   :  { %v1469_v60 = vpop.eup %1468  ;;  %v359_v63 = vadd.f32 1.0, %v1467_v59 }
 0x11f   :  { %1472 = vrcp.f32 %v358_v58  ;;  %v379_v58 = vunpack.c.h.bf16 %v375_v52 }
 0x120   :  { %1474 = vrcp.f32 %v359_v63 }
 0x12a   :  { %v1471_v61 = vpop.eup %1470 }
 0x12b   :  { %v368_v34 = vmul.f32 %v1471_v61, %v1469_v60 }
 0x12c   :  { %v1473_v62 = vpop.eup %1472 }
 0x12d   :  { %v367_v32 = vmul.f32 0.0, %v1473_v62  ;;  %v1475_v36 = vpop.eup %1474 }
 0x12f   :  { %v1892_v35 = vadd.f32 %v368_v34, %v367_v32 }
 0x131   :  { %1476 = vtanh.f32 %v1892_v35 }
 0x13e   :  { %v1477_v37 = vpop.eup %1476 }
 0x13f   :  { %v371_v38 = vmul.f32 %v1477_v37, %v1475_v36 }
 0x141   :  { %v372_v39 = vpack.c.bf16 %v371_v38, %v371_v38 }
 0x143   :  { %413 = vmatmul.mubr.bf16.vlgmr.msra.gmra.mxu0 %v372_v39  ;;  %454 = vmatmul.mubr.bf16.vlgmr.msra.gmra.mxu1 %v372_v39 }
 0x144   :  { %495 = vmatpush1.bf16.msra.mxu0 %v1762_v2  ;;  %536 = vmatpush1.bf16.msra.mxu1 %v1775_v7 }
 0x145   :  { %496 = vmatprep.subr.bf16.mxu0 %v1765_v3  ;;  %537 = vmatprep.subr.bf16.mxu1 %v1785_v10 }
 0x146   :  { %526 = vmatprep.mubr.bf16.mxu0 %v1719_v0  ;;  %567 = vmatprep.mubr.bf16.mxu1 %v1719_v0 }
 0x148   :  { %497 = vmatpush1.bf16.msra.mxu0 %v1768_v4  ;;  %538 = vmatpush1.bf16.msra.mxu1 %v1787_v11 }
 0x149   :  { %498 = vmatprep.subr.bf16.mxu0 %v1771_v5  ;;  %539 = vmatprep.subr.bf16.mxu1 %v1795_v14 }
 0x14c   :  { %499 = vmatpush1.bf16.msra.mxu0 %v1778_v8  ;;  %540 = vmatpush1.bf16.msra.mxu1 %v1799_v15 }
 0x14d   :  { %500 = vmatprep.subr.bf16.mxu0 %v1782_v9  ;;  %541 = vmatprep.subr.bf16.mxu1 %v1802_v16 }
 0x150   :  { %501 = vmatpush1.bf16.msra.mxu0 %v1791_v12  ;;  %542 = vmatpush1.bf16.msra.mxu1 %v1811_v19 }
 0x151   :  { %502 = vmatprep.subr.bf16.mxu0 %v1793_v13  ;;  %543 = vmatprep.subr.bf16.mxu1 %v1814_v20 }
 0x154   :  { %503 = vmatpush1.bf16.msra.mxu0 %v1805_v17  ;;  %544 = vmatpush1.bf16.msra.mxu1 %v1823_v23 }
 0x155   :  { %504 = vmatprep.subr.bf16.mxu0 %v1808_v18  ;;  %545 = vmatprep.subr.bf16.mxu1 %v1826_v24 }
 0x158   :  { %505 = vmatpush1.bf16.msra.mxu0 %v1816_v21  ;;  %546 = vmatpush1.bf16.msra.mxu1 %v1835_v27 }
 0x159   :  { %506 = vmatprep.subr.bf16.mxu0 %v1819_v22  ;;  %547 = vmatprep.subr.bf16.mxu1 %v1838_v28 }
 0x15c   :  { %507 = vmatpush1.bf16.msra.mxu0 %v1829_v25  ;;  %548 = vmatpush1.bf16.msra.mxu1 %v1845_v30 }
 0x15d   :  { %508 = vmatprep.subr.bf16.mxu0 %v1832_v26  ;;  %549 = vmatprep.subr.bf16.mxu1 %v1848_v31 }
 0x160   :  { %509 = vmatpush1.bf16.msra.mxu0 %v1841_v29  ;;  %550 = vmatpush1.bf16.msra.mxu1 %v1852_v33 }
 0x161   :  { %608 = vmatprep.subr.bf16.mxu0 %v1760_v1  ;;  %649 = vmatprep.subr.bf16.mxu1 %v1773_v6 }
 0x203   :  { %v414_v43 = vpop.f32.mrf.mxu0  ;;  %v455_v44 = vpop.f32.mrf.mxu1 }
 0x204   :  { %v415_v45 = vadd.f32 %v414_v43, %v376_v41  ;;  %v456_v57 = vadd.f32 %v455_v44, %v378_v56 }
 0x205   :  { %v416_v46 = vpop.f32.mrf.mxu0  ;;  %v457_v47 = vpop.f32.mrf.mxu1 }
 0x206   :  { %v1328_v48 = vmul.f32 -1.442695, %v415_v45  ;;  %v417_v49 = vadd.f32 %v416_v46, %v377_v42  ;;  %v1330_v59 = vmul.f32 -1.442695, %v456_v57  ;;  %v458_v61 = vadd.f32 %v457_v47, %v379_v58  ;;  %v489_v58 = vld [vmem:[#allocation4 + $0x28] sm:$0xff] }
 0x207   :  { %v418_v50 = vpop.f32.mrf.mxu0  ;;  %v459_v51 = vpop.f32.mrf.mxu1 }
 0x208   :  { %1478 = vpow2.f32 %v1328_v48  ;;  %v1329_v53 = vmul.f32 -1.442695, %v417_v49 }
 0x209   :  { %v419_v54 = vpop.f32.mrf.mxu0  ;;  %v460_v55 = vpop.f32.mrf.mxu1 }
 0x20a   :  { %1480 = vpow2.f32 %v1329_v53 }
 0x20b   :  { %1482 = vpow2.f32 %v1330_v59 }
 0x215   :  { %v1479_v60 = vpop.eup %1478 }
 0x216   :  { %v471_v62 = vadd.f32 1.0, %v1479_v60 }
 0x217   :  { %v1481_v63 = vpop.eup %1480 }
 0x218   :  { %1484 = vrcp.f32 %v471_v62  ;;  %v472_v32 = vadd.f32 1.0, %v1481_v63  ;;  %v1483_v34 = vpop.eup %1482  ;;  %v492_v62 = vunpack.c.l.bf16 %v489_v58 }
 0x219   :  { %1486 = vtanh.f32 %v458_v61  ;;  %v473_v39 = vadd.f32 1.0, %v1483_v34 }
 0x21a   :  { %1488 = vrcp.f32 %v472_v32  ;;  %v493_v32 = vunpack.c.h.bf16 %v489_v58 }
 0x21b   :  { %1490 = vrcp.f32 %v473_v39 }
 0x225   :  { %v1485_v36 = vpop.eup %1484 }
 0x226   :  { %v1487_v37 = vpop.eup %1486 }
 0x227   :  { %v1489_v38 = vpop.eup %1488  ;;  %v482_v41 = vmul.f32 %v1487_v37, %v1485_v36 }
 0x228   :  { %v481_v40 = vmul.f32 %v1489_v38, %v1892_v35  ;;  %v1491_v43 = vpop.eup %1490  ;;  %v488_v35 = vld [vmem:[#allocation4 + $0x20] sm:$0xff] }
 0x229   :  { %v490_v47 = vunpack.c.l.bf16 %v488_v35  ;;  %v491_v48 = vunpack.c.h.bf16 %v488_v35 }
 0x22a   :  { %v1930_v42 = vadd.f32 %v482_v41, %v481_v40 }
 0x22c   :  { %1492 = vtanh.f32 %v1930_v42 }
 0x239   :  { %v1493_v44 = vpop.eup %1492 }
 0x23a   :  { %v485_v45 = vmul.f32 %v1493_v44, %v1491_v43 }
 0x23c   :  { %v486_v46 = vpack.c.bf16 %v485_v45, %v485_v45 }
 0x23e   :  { %527 = vmatmul.mubr.bf16.vlgmr.msra.gmra.mxu0 %v486_v46  ;;  %568 = vmatmul.mubr.bf16.vlgmr.msra.gmra.mxu1 %v486_v46 }
 0x23f   :  { %609 = vmatpush1.bf16.msra.mxu0 %v1762_v2  ;;  %650 = vmatpush1.bf16.msra.mxu1 %v1775_v7 }
 0x240   :  { %610 = vmatprep.subr.bf16.mxu0 %v1765_v3  ;;  %651 = vmatprep.subr.bf16.mxu1 %v1785_v10 }
 0x241   :  { %640 = vmatprep.mubr.bf16.mxu0 %v1719_v0  ;;  %681 = vmatprep.mubr.bf16.mxu1 %v1719_v0 }
 0x243   :  { %611 = vmatpush1.bf16.msra.mxu0 %v1768_v4  ;;  %652 = vmatpush1.bf16.msra.mxu1 %v1787_v11 }
 0x244   :  { %612 = vmatprep.subr.bf16.mxu0 %v1771_v5  ;;  %653 = vmatprep.subr.bf16.mxu1 %v1795_v14 }
 0x247   :  { %613 = vmatpush1.bf16.msra.mxu0 %v1778_v8  ;;  %654 = vmatpush1.bf16.msra.mxu1 %v1799_v15 }
 0x248   :  { %614 = vmatprep.subr.bf16.mxu0 %v1782_v9  ;;  %655 = vmatprep.subr.bf16.mxu1 %v1802_v16 }
 0x24b   :  { %615 = vmatpush1.bf16.msra.mxu0 %v1791_v12  ;;  %656 = vmatpush1.bf16.msra.mxu1 %v1811_v19 }
 0x24c   :  { %616 = vmatprep.subr.bf16.mxu0 %v1793_v13  ;;  %657 = vmatprep.subr.bf16.mxu1 %v1814_v20 }
 0x24f   :  { %617 = vmatpush1.bf16.msra.mxu0 %v1805_v17  ;;  %658 = vmatpush1.bf16.msra.mxu1 %v1823_v23 }
 0x250   :  { %618 = vmatprep.subr.bf16.mxu0 %v1808_v18  ;;  %659 = vmatprep.subr.bf16.mxu1 %v1826_v24 }
 0x253   :  { %619 = vmatpush1.bf16.msra.mxu0 %v1816_v21  ;;  %660 = vmatpush1.bf16.msra.mxu1 %v1835_v27 }
 0x254   :  { %620 = vmatprep.subr.bf16.mxu0 %v1819_v22  ;;  %661 = vmatprep.subr.bf16.mxu1 %v1838_v28 }
 0x257   :  { %621 = vmatpush1.bf16.msra.mxu0 %v1829_v25  ;;  %662 = vmatpush1.bf16.msra.mxu1 %v1845_v30 }
 0x258   :  { %622 = vmatprep.subr.bf16.mxu0 %v1832_v26  ;;  %663 = vmatprep.subr.bf16.mxu1 %v1848_v31 }
 0x25b   :  { %623 = vmatpush1.bf16.msra.mxu0 %v1841_v29  ;;  %664 = vmatpush1.bf16.msra.mxu1 %v1852_v33 }
 0x25c   :  { %722 = vmatprep.subr.bf16.mxu0 %v1760_v1  ;;  %763 = vmatprep.subr.bf16.mxu1 %v1773_v6 }
 0x2fe   :  { %v528_v49 = vpop.f32.mrf.mxu0  ;;  %v569_v50 = vpop.f32.mrf.mxu1 }
 0x2ff   :  { %v529_v51 = vadd.f32 %v528_v49, %v490_v47  ;;  %v570_v63 = vadd.f32 %v569_v50, %v492_v62 }
 0x300   :  { %v530_v52 = vpop.f32.mrf.mxu0  ;;  %v571_v53 = vpop.f32.mrf.mxu1 }
 0x301   :  { %v1331_v54 = vmul.f32 -1.442695, %v529_v51  ;;  %v531_v55 = vadd.f32 %v530_v52, %v491_v48  ;;  %v1333_v34 = vmul.f32 -1.442695, %v570_v63  ;;  %v572_v37 = vadd.f32 %v571_v53, %v493_v32  ;;  %v603_v32 = vld [vmem:[#allocation4 + $0x38] sm:$0xff] }
 0x302   :  { %v532_v56 = vpop.f32.mrf.mxu0  ;;  %v573_v57 = vpop.f32.mrf.mxu1 }
 0x303   :  { %1494 = vpow2.f32 %v1331_v54  ;;  %v1332_v59 = vmul.f32 -1.442695, %v531_v55 }
 0x304   :  { %v533_v60 = vpop.f32.mrf.mxu0  ;;  %v574_v61 = vpop.f32.mrf.mxu1 }
 0x305   :  { %1496 = vpow2.f32 %v1332_v59 }
 0x306   :  { %1498 = vpow2.f32 %v1333_v34 }
 0x310   :  { %v1495_v36 = vpop.eup %1494 }
 0x311   :  { %v585_v38 = vadd.f32 1.0, %v1495_v36 }
 0x312   :  { %v1497_v39 = vpop.eup %1496 }
 0x313   :  { %1500 = vrcp.f32 %v585_v38  ;;  %v586_v40 = vadd.f32 1.0, %v1497_v39  ;;  %v1499_v41 = vpop.eup %1498  ;;  %v606_v38 = vunpack.c.l.bf16 %v603_v32 }
 0x314   :  { %1502 = vtanh.f32 %v572_v37  ;;  %v587_v46 = vadd.f32 1.0, %v1499_v41 }
 0x315   :  { %1504 = vrcp.f32 %v586_v40  ;;  %v607_v40 = vunpack.c.h.bf16 %v603_v32 }
 0x316   :  { %1506 = vrcp.f32 %v587_v46 }
 0x320   :  { %v1501_v43 = vpop.eup %1500 }
 0x321   :  { %v1503_v44 = vpop.eup %1502 }
 0x322   :  { %v1505_v45 = vpop.eup %1504  ;;  %v596_v47 = vmul.f32 %v1503_v44, %v1501_v43 }
 0x323   :  { %v595_v35 = vmul.f32 %v1505_v45, %v1930_v42  ;;  %v1507_v49 = vpop.eup %1506  ;;  %v602_v42 = vld [vmem:[#allocation4 + $0x30] sm:$0xff] }
 0x324   :  { %v604_v53 = vunpack.c.l.bf16 %v602_v42  ;;  %v605_v54 = vunpack.c.h.bf16 %v602_v42 }
 0x325   :  { %v1968_v48 = vadd.f32 %v596_v47, %v595_v35 }
 0x327   :  { %1508 = vtanh.f32 %v1968_v48 }
 0x334   :  { %v1509_v50 = vpop.eup %1508 }
 0x335   :  { %v599_v51 = vmul.f32 %v1509_v50, %v1507_v49 }
 0x337   :  { %v600_v52 = vpack.c.bf16 %v599_v51, %v599_v51 }
 0x339   :  { %641 = vmatmul.mubr.bf16.vlgmr.msra.gmra.mxu0 %v600_v52  ;;  %682 = vmatmul.mubr.bf16.vlgmr.msra.gmra.mxu1 %v600_v52 }
 0x33a   :  { %723 = vmatpush1.bf16.msra.mxu0 %v1762_v2  ;;  %764 = vmatpush1.bf16.msra.mxu1 %v1775_v7 }
 0x33b   :  { %724 = vmatprep.subr.bf16.mxu0 %v1765_v3  ;;  %765 = vmatprep.subr.bf16.mxu1 %v1785_v10 }
 0x33c   :  { %754 = vmatprep.mubr.bf16.mxu0 %v1719_v0  ;;  %795 = vmatprep.mubr.bf16.mxu1 %v1719_v0 }
 0x33e   :  { %725 = vmatpush1.bf16.msra.mxu0 %v1768_v4  ;;  %766 = vmatpush1.bf16.msra.mxu1 %v1787_v11 }
 0x33f   :  { %726 = vmatprep.subr.bf16.mxu0 %v1771_v5  ;;  %767 = vmatprep.subr.bf16.mxu1 %v1795_v14 }
 0x342   :  { %727 = vmatpush1.bf16.msra.mxu0 %v1778_v8  ;;  %768 = vmatpush1.bf16.msra.mxu1 %v1799_v15 }
 0x343   :  { %728 = vmatprep.subr.bf16.mxu0 %v1782_v9  ;;  %769 = vmatprep.subr.bf16.mxu1 %v1802_v16 }
 0x346   :  { %729 = vmatpush1.bf16.msra.mxu0 %v1791_v12  ;;  %770 = vmatpush1.bf16.msra.mxu1 %v1811_v19 }
 0x347   :  { %730 = vmatprep.subr.bf16.mxu0 %v1793_v13  ;;  %771 = vmatprep.subr.bf16.mxu1 %v1814_v20 }
 0x34a   :  { %731 = vmatpush1.bf16.msra.mxu0 %v1805_v17  ;;  %772 = vmatpush1.bf16.msra.mxu1 %v1823_v23 }
 0x34b   :  { %732 = vmatprep.subr.bf16.mxu0 %v1808_v18  ;;  %773 = vmatprep.subr.bf16.mxu1 %v1826_v24 }
 0x34e   :  { %733 = vmatpush1.bf16.msra.mxu0 %v1816_v21  ;;  %774 = vmatpush1.bf16.msra.mxu1 %v1835_v27 }
 0x34f   :  { %734 = vmatprep.subr.bf16.mxu0 %v1819_v22  ;;  %775 = vmatprep.subr.bf16.mxu1 %v1838_v28 }
 0x352   :  { %735 = vmatpush1.bf16.msra.mxu0 %v1829_v25  ;;  %776 = vmatpush1.bf16.msra.mxu1 %v1845_v30 }
 0x353   :  { %736 = vmatprep.subr.bf16.mxu0 %v1832_v26  ;;  %777 = vmatprep.subr.bf16.mxu1 %v1848_v31 }
 0x356   :  { %737 = vmatpush1.bf16.msra.mxu0 %v1841_v29  ;;  %778 = vmatpush1.bf16.msra.mxu1 %v1852_v33 }
 0x357   :  { %836 = vmatprep.subr.bf16.mxu0 %v1760_v1  ;;  %877 = vmatprep.subr.bf16.mxu1 %v1773_v6 }
 0x3f9   :  { %v642_v55 = vpop.f32.mrf.mxu0  ;;  %v683_v56 = vpop.f32.mrf.mxu1 }
 0x3fa   :  { %v643_v57 = vadd.f32 %v642_v55, %v604_v53  ;;  %v684_v39 = vadd.f32 %v683_v56, %v606_v38 }
 0x3fb   :  { %v644_v58 = vpop.f32.mrf.mxu0  ;;  %v685_v59 = vpop.f32.mrf.mxu1 }
 0x3fc   :  { %v1334_v60 = vmul.f32 -1.442695, %v643_v57  ;;  %v645_v61 = vadd.f32 %v644_v58, %v605_v54  ;;  %v1336_v41 = vmul.f32 -1.442695, %v684_v39  ;;  %v686_v44 = vadd.f32 %v685_v59, %v607_v40  ;;  %v717_v40 = vld [vmem:[#allocation4 + $0x48] sm:$0xff] }
 0x3fd   :  { %v646_v62 = vpop.f32.mrf.mxu0  ;;  %v687_v63 = vpop.f32.mrf.mxu1 }
 0x3fe   :  { %1510 = vpow2.f32 %v1334_v60  ;;  %v1335_v34 = vmul.f32 -1.442695, %v645_v61 }
 0x3ff   :  { %v647_v36 = vpop.f32.mrf.mxu0  ;;  %v688_v37 = vpop.f32.mrf.mxu1 }
 0x400   :  { %1512 = vpow2.f32 %v1335_v34 }
 0x401   :  { %1514 = vpow2.f32 %v1336_v41 }
 0x40b   :  { %v1511_v43 = vpop.eup %1510 }
 0x40c   :  { %v699_v45 = vadd.f32 1.0, %v1511_v43 }
 0x40d   :  { %v1513_v46 = vpop.eup %1512 }
 0x40e   :  { %1516 = vrcp.f32 %v699_v45  ;;  %v700_v35 = vadd.f32 1.0, %v1513_v46  ;;  %v1515_v47 = vpop.eup %1514  ;;  %v721_v45 = vunpack.c.h.bf16 %v717_v40 }
 0x40f   :  { %1518 = vtanh.f32 %v686_v44  ;;  %v701_v52 = vadd.f32 1.0, %v1515_v47 }
 0x410   :  { %1520 = vrcp.f32 %v700_v35 }
 0x411   :  { %1522 = vrcp.f32 %v701_v52 }
 0x41b   :  { %v1517_v49 = vpop.eup %1516 }
 0x41c   :  { %v1519_v50 = vpop.eup %1518 }
 0x41d   :  { %v1521_v51 = vpop.eup %1520  ;;  %v710_v53 = vmul.f32 %v1519_v50, %v1517_v49 }
 0x41e   :  { %v709_v42 = vmul.f32 %v1521_v51, %v1968_v48  ;;  %v1523_v55 = vpop.eup %1522  ;;  %v716_v48 = vld [vmem:[#allocation4 + $0x40] sm:$0xff] }
 0x41f   :  { %v718_v59 = vunpack.c.l.bf16 %v716_v48  ;;  %v719_v60 = vunpack.c.h.bf16 %v716_v48 }
 0x420   :  { %v2006_v54 = vadd.f32 %v710_v53, %v709_v42 }
 0x422   :  { %1524 = vtanh.f32 %v2006_v54 }
 0x42f   :  { %v1525_v56 = vpop.eup %1524 }
 0x430   :  { %v713_v57 = vmul.f32 %v1525_v56, %v1523_v55 }
 0x432   :  { %v714_v58 = vpack.c.bf16 %v713_v57, %v713_v57 }
 0x434   :  { %755 = vmatmul.mubr.bf16.vlgmr.msra.gmra.mxu0 %v714_v58  ;;  %796 = vmatmul.mubr.bf16.vlgmr.msra.gmra.mxu1 %v714_v58 }
 0x435   :  { %837 = vmatpush1.bf16.msra.mxu0 %v1762_v2  ;;  %878 = vmatpush1.bf16.msra.mxu1 %v1775_v7 }
 0x436   :  { %838 = vmatprep.subr.bf16.mxu0 %v1765_v3  ;;  %879 = vmatprep.subr.bf16.mxu1 %v1785_v10 }
 0x437   :  { %868 = vmatprep.mubr.bf16.mxu0 %v1719_v0  ;;  %909 = vmatprep.mubr.bf16.mxu1 %v1719_v0 }
 0x439   :  { %839 = vmatpush1.bf16.msra.mxu0 %v1768_v4  ;;  %880 = vmatpush1.bf16.msra.mxu1 %v1787_v11 }
 0x43a   :  { %840 = vmatprep.subr.bf16.mxu0 %v1771_v5  ;;  %881 = vmatprep.subr.bf16.mxu1 %v1795_v14 }
 0x43d   :  { %841 = vmatpush1.bf16.msra.mxu0 %v1778_v8  ;;  %882 = vmatpush1.bf16.msra.mxu1 %v1799_v15 }
 0x43e   :  { %842 = vmatprep.subr.bf16.mxu0 %v1782_v9  ;;  %883 = vmatprep.subr.bf16.mxu1 %v1802_v16 }
 0x441   :  { %843 = vmatpush1.bf16.msra.mxu0 %v1791_v12  ;;  %884 = vmatpush1.bf16.msra.mxu1 %v1811_v19 }
 0x442   :  { %844 = vmatprep.subr.bf16.mxu0 %v1793_v13  ;;  %885 = vmatprep.subr.bf16.mxu1 %v1814_v20 }
 0x445   :  { %845 = vmatpush1.bf16.msra.mxu0 %v1805_v17  ;;  %886 = vmatpush1.bf16.msra.mxu1 %v1823_v23 }
 0x446   :  { %846 = vmatprep.subr.bf16.mxu0 %v1808_v18  ;;  %887 = vmatprep.subr.bf16.mxu1 %v1826_v24 }
 0x449   :  { %847 = vmatpush1.bf16.msra.mxu0 %v1816_v21  ;;  %888 = vmatpush1.bf16.msra.mxu1 %v1835_v27 }
 0x44a   :  { %848 = vmatprep.subr.bf16.mxu0 %v1819_v22  ;;  %889 = vmatprep.subr.bf16.mxu1 %v1838_v28 }
 0x44d   :  { %849 = vmatpush1.bf16.msra.mxu0 %v1829_v25  ;;  %890 = vmatpush1.bf16.msra.mxu1 %v1845_v30 }
 0x44e   :  { %850 = vmatprep.subr.bf16.mxu0 %v1832_v26  ;;  %891 = vmatprep.subr.bf16.mxu1 %v1848_v31 }
 0x451   :  { %851 = vmatpush1.bf16.msra.mxu0 %v1841_v29  ;;  %892 = vmatpush1.bf16.msra.mxu1 %v1852_v33 }
 0x452   :  { %950 = vmatprep.subr.bf16.mxu0 %v1760_v1  ;;  %991 = vmatprep.subr.bf16.mxu1 %v1773_v6  ;;  %v720_v1 = vunpack.c.l.bf16 %v717_v40 }
 0x4f4   :  { %v756_v61 = vpop.f32.mrf.mxu0  ;;  %v797_v62 = vpop.f32.mrf.mxu1 }
 0x4f5   :  { %v757_v63 = vadd.f32 %v756_v61, %v718_v59  ;;  %v798_v6 = vadd.f32 %v797_v62, %v720_v1  ;;  %v1599_v1 = vld [vmem:[#allocation7 + $0xcc] ss:$16 sps:$4 sm:$0xff]  }
 0x4f6   :  { %v758_v32 = vpop.f32.mrf.mxu0  ;;  %v799_v34 = vpop.f32.mrf.mxu1 }
 0x4f7   :  { %v1337_v36 = vmul.f32 -1.442695, %v757_v63  ;;  %v759_v37 = vadd.f32 %v758_v32, %v719_v60  ;;  %v1339_v46 = vmul.f32 -1.442695, %v798_v6  ;;  %v800_v47 = vadd.f32 %v799_v34, %v721_v45  ;;  %v1600_v6 = vld [vmem:[#allocation7 + $0xc0] ss:$16 sps:$4 sm:$0xff]  }
 0x4f8   :  { %v760_v38 = vpop.f32.mrf.mxu0  ;;  %v801_v39 = vpop.f32.mrf.mxu1  ;;  %v1601_v45 = vld [vmem:[#allocation7 + $0xc8] ss:$16 sps:$4 sm:$0xff]  }
 0x4f9   :  { %1526 = vpow2.f32 %v1337_v36  ;;  %v1338_v41 = vmul.f32 -1.442695, %v759_v37 }
 0x4fa   :  { %v761_v43 = vpop.f32.mrf.mxu0  ;;  %v802_v44 = vpop.f32.mrf.mxu1 }
 0x4fb   :  { %1528 = vpow2.f32 %v1338_v41  ;;  %v1596_v41 = vld [vmem:[#allocation7 + $0xe0] ss:$16 sps:$4 sm:$0xff]   ;;  %v1597_v43 = vld [vmem:[#allocation7 + $0xe8] ss:$16 sps:$4 sm:$0xff]   ;;  %v1598_v44 = vld [vmem:[#allocation7 + $0xc4] ss:$16 sps:$4 sm:$0xff]  }
 0x4fc   :  { %1530 = vpow2.f32 %v1339_v46  ;;  %v1602_v46 = vld [vmem:[#allocation7 + $0xa4] ss:$16 sps:$4 sm:$0xff]  }
 0x506   :  { %v1527_v35 = vpop.eup %1526 }
 0x507   :  { %v813_v49 = vadd.f32 1.0, %v1527_v35  ;;  %v1603_v35 = vld [vmem:[#allocation7 + $0xac] ss:$16 sps:$4 sm:$0xff]  }
 0x508   :  { %v1529_v50 = vpop.eup %1528 }
 0x509   :  { %1532 = vrcp.f32 %v813_v49  ;;  %v814_v51 = vadd.f32 1.0, %v1529_v50  ;;  %v1531_v52 = vpop.eup %1530  ;;  %v1605_v49 = vld [vmem:[#allocation7 + $0xa8] ss:$16 sps:$4 sm:$0xff]   ;;  %v1606_v50 = vld [vmem:[#allocation7 + $0x84] ss:$16 sps:$4 sm:$0xff]  }
 0x50a   :  { %1534 = vtanh.f32 %v800_v47  ;;  %v815_v56 = vadd.f32 1.0, %v1531_v52  ;;  %v1604_v47 = vld [vmem:[#allocation7 + $0xa0] ss:$16 sps:$4 sm:$0xff]  }
 0x50b   :  { %1536 = vrcp.f32 %v814_v51  ;;  %v1607_v51 = vld [vmem:[#allocation7 + $0x8c] ss:$16 sps:$4 sm:$0xff]   ;;  %v1608_v52 = vld [vmem:[#allocation7 + $0x80] ss:$16 sps:$4 sm:$0xff]  }
 0x50c   :  { %1538 = vrcp.f32 %v815_v56  ;;  %v1613_v56 = vld [vmem:[#allocation7 + $0x68] ss:$16 sps:$4 sm:$0xff]  }
 0x516   :  { %v1533_v42 = vpop.eup %1532 }
 0x517   :  { %v1535_v53 = vpop.eup %1534 }
 0x518   :  { %v1537_v55 = vpop.eup %1536  ;;  %v824_v58 = vmul.f32 %v1535_v53, %v1533_v42  ;;  %v1609_v42 = vld [vmem:[#allocation7 + $0x88] ss:$16 sps:$4 sm:$0xff]   ;;  %v1611_v53 = vld [vmem:[#allocation7 + $0x6c] ss:$16 sps:$4 sm:$0xff]  }
 0x519   :  { %v823_v57 = vmul.f32 %v1537_v55, %v2006_v54  ;;  %v1539_v59 = vpop.eup %1538  ;;  %v1612_v55 = vld [vmem:[#allocation7 + $0x60] ss:$16 sps:$4 sm:$0xff]  }
 0x51b   :  { %v2044_v48 = vadd.f32 %v824_v58, %v823_v57  ;;  %v1614_v57 = vld [vmem:[#allocation7 + $0x44] ss:$16 sps:$4 sm:$0xff]   ;;  %v1615_v58 = vld [vmem:[#allocation7 + $0x4c] ss:$16 sps:$4 sm:$0xff]  }
 0x51d   :  { %1540 = vtanh.f32 %v2044_v48 }
 0x52a   :  { %v1541_v60 = vpop.eup %1540 }
 0x52b   :  { %v827_v61 = vmul.f32 %v1541_v60, %v1539_v59  ;;  %v1617_v59 = vld [vmem:[#allocation7 + $0x48] ss:$16 sps:$4 sm:$0xff]   ;;  %v1618_v60 = vld [vmem:[#allocation7 + $0x24] ss:$16 sps:$4 sm:$0xff]  }
 0x52d   :  { %v828_v62 = vpack.c.bf16 %v827_v61, %v827_v61  ;;  %v1619_v61 = vld [vmem:[#allocation7 + $0x2c] ss:$16 sps:$4 sm:$0xff]  }
 0x52f   :  { %869 = vmatmul.mubr.bf16.vlgmr.msra.gmra.mxu0 %v828_v62  ;;  %910 = vmatmul.mubr.bf16.vlgmr.msra.gmra.mxu1 %v828_v62  ;;  %v1620_v62 = vld [vmem:[#allocation7 + $0x20] ss:$16 sps:$4 sm:$0xff]  }
 0x530   :  { %951 = vmatpush1.bf16.msra.mxu0 %v1762_v2  ;;  %992 = vmatpush1.bf16.msra.mxu1 %v1775_v7  ;;  %v1594_v2 = vld [vmem:[#allocation7 + $0xe4] ss:$16 sps:$4 sm:$0xff]  }
 0x531   :  { %952 = vmatprep.subr.bf16.mxu0 %v1765_v3  ;;  %993 = vmatprep.subr.bf16.mxu1 %v1785_v10  ;;  %v1595_v3 = vld [vmem:[#allocation7 + $0xec] ss:$16 sps:$4 sm:$0xff]  }
 0x532   :  { %982 = vmatprep.mubr.bf16.mxu0 %v1719_v0  ;;  %1023 = vmatprep.mubr.bf16.mxu1 %v1719_v0 }
 0x534   :  { %953 = vmatpush1.bf16.msra.mxu0 %v1768_v4  ;;  %994 = vmatpush1.bf16.msra.mxu1 %v1787_v11  ;;  %v830_v4 = vld [vmem:[#allocation4 + $0x50] sm:$0xff] }
 0x535   :  { %954 = vmatprep.subr.bf16.mxu0 %v1771_v5  ;;  %995 = vmatprep.subr.bf16.mxu1 %v1795_v14  ;;  %v832_v5 = vunpack.c.l.bf16 %v830_v4  ;;  %v833_v7 = vunpack.c.h.bf16 %v830_v4  ;;  %v1623_v4 = vld [vmem:[#allocation7 + $0xc] ss:$16 sps:$4 sm:$0xff]  }
 0x538   :  { %955 = vmatpush1.bf16.msra.mxu0 %v1778_v8  ;;  %996 = vmatpush1.bf16.msra.mxu1 %v1799_v15 }
 0x539   :  { %956 = vmatprep.subr.bf16.mxu0 %v1782_v9  ;;  %997 = vmatprep.subr.bf16.mxu1 %v1802_v16 }
 0x53c   :  { %957 = vmatpush1.bf16.msra.mxu0 %v1791_v12  ;;  %998 = vmatpush1.bf16.msra.mxu1 %v1811_v19 }
 0x53d   :  { %958 = vmatprep.subr.bf16.mxu0 %v1793_v13  ;;  %999 = vmatprep.subr.bf16.mxu1 %v1814_v20 }
 0x540   :  { %959 = vmatpush1.bf16.msra.mxu0 %v1805_v17  ;;  %1000 = vmatpush1.bf16.msra.mxu1 %v1823_v23  ;;  %v831_v17 = vld [vmem:[#allocation4 + $0x58] sm:$0xff] }
 0x541   :  { %960 = vmatprep.subr.bf16.mxu0 %v1808_v18  ;;  %1001 = vmatprep.subr.bf16.mxu1 %v1826_v24  ;;  %v835_v23 = vunpack.c.h.bf16 %v831_v17 }
 0x544   :  { %961 = vmatpush1.bf16.msra.mxu0 %v1816_v21  ;;  %1002 = vmatpush1.bf16.msra.mxu1 %v1835_v27  ;;  %v834_v21 = vunpack.c.l.bf16 %v831_v17 }
 0x545   :  { %962 = vmatprep.subr.bf16.mxu0 %v1819_v22  ;;  %1003 = vmatprep.subr.bf16.mxu1 %v1838_v28 }
 0x548   :  { %963 = vmatpush1.bf16.msra.mxu0 %v1829_v25  ;;  %1004 = vmatpush1.bf16.msra.mxu1 %v1845_v30 }
 0x549   :  { %964 = vmatprep.subr.bf16.mxu0 %v1832_v26  ;;  %1005 = vmatprep.subr.bf16.mxu1 %v1848_v31 }
 0x54c   :  { %965 = vmatpush1.bf16.msra.mxu0 %v1841_v29  ;;  %1006 = vmatpush1.bf16.msra.mxu1 %v1852_v33 }
 0x54d   :  { %1064 = vmatprep.subr.bf16.mxu0 %v1594_v2  ;;  %1105 = vmatprep.subr.bf16.mxu1 %v1595_v3  ;;  %v1621_v2 = vld [vmem:[#allocation7 + $0x28] ss:$16 sps:$4 sm:$0xff]   ;;  %v1622_v3 = vld [vmem:[#allocation7 + $0x4] ss:$16 sps:$4 sm:$0xff]  }
 0x5ef   :  { %v870_v8 = vpop.f32.mrf.mxu0  ;;  %v911_v9 = vpop.f32.mrf.mxu1 }
 0x5f0   :  { %v871_v10 = vadd.f32 %v870_v8, %v832_v5  ;;  %v912_v22 = vadd.f32 %v911_v9, %v834_v21  ;;  %v1624_v5 = vld [vmem:[#allocation7] ss:$16 sps:$4 sm:$0xff]  }
 0x5f1   :  { %v872_v11 = vpop.f32.mrf.mxu0  ;;  %v913_v12 = vpop.f32.mrf.mxu1  ;;  %v944_v8 = vld [vmem:[#allocation4 + $0x60] sm:$0xff] }
 0x5f2   :  { %v1340_v13 = vmul.f32 -1.442695, %v871_v10  ;;  %v873_v14 = vadd.f32 %v872_v11, %v833_v7  ;;  %v1342_v24 = vmul.f32 -1.442695, %v912_v22  ;;  %v914_v26 = vadd.f32 %v913_v12, %v835_v23  ;;  %v1625_v7 = vld [vmem:[#allocation7 + $0x8] ss:$16 sps:$4 sm:$0xff]  }
 0x5f3   :  { %v874_v15 = vpop.f32.mrf.mxu0  ;;  %v915_v16 = vpop.f32.mrf.mxu1  ;;  %v946_v9 = vunpack.c.l.bf16 %v944_v8  ;;  %v947_v10 = vunpack.c.h.bf16 %v944_v8 }
 0x5f4   :  { %1542 = vpow2.f32 %v1340_v13  ;;  %v1341_v18 = vmul.f32 -1.442695, %v873_v14 }
 0x5f5   :  { %v875_v19 = vpop.f32.mrf.mxu0  ;;  %v916_v20 = vpop.f32.mrf.mxu1 }
 0x5f6   :  { %1544 = vpow2.f32 %v1341_v18  ;;  %v945_v20 = vld [vmem:[#allocation4 + $0x68] sm:$0xff] }
 0x5f7   :  { %1546 = vpow2.f32 %v1342_v24  ;;  %v948_v24 = vunpack.c.l.bf16 %v945_v20 }
 0x601   :  { %v1543_v25 = vpop.eup %1542 }
 0x602   :  { %v927_v27 = vadd.f32 1.0, %v1543_v25 }
 0x603   :  { %v1545_v28 = vpop.eup %1544 }
 0x604   :  { %1548 = vrcp.f32 %v927_v27  ;;  %v928_v29 = vadd.f32 1.0, %v1545_v28  ;;  %v1547_v30 = vpop.eup %1546 }
 0x605   :  { %1550 = vtanh.f32 %v914_v26  ;;  %v929_v63 = vadd.f32 1.0, %v1547_v30  ;;  %v949_v26 = vunpack.c.h.bf16 %v945_v20 }
 0x606   :  { %1552 = vrcp.f32 %v928_v29 }
 0x607   :  { %1554 = vrcp.f32 %v929_v63 }
 0x611   :  { %v1549_v31 = vpop.eup %1548 }
 0x612   :  { %v1551_v33 = vpop.eup %1550 }
 0x613   :  { %v1553_v54 = vpop.eup %1552  ;;  %v938_v34 = vmul.f32 %v1551_v33, %v1549_v31 }
 0x614   :  { %v937_v32 = vmul.f32 %v1553_v54, %v2044_v48  ;;  %v1555_v37 = vpop.eup %1554  ;;  %v1616_v48 = vld [vmem:[#allocation7 + $0x40] ss:$16 sps:$4 sm:$0xff]  }
 0x616   :  { %v2080_v36 = vadd.f32 %v938_v34, %v937_v32 }
 0x618   :  { %1556 = vtanh.f32 %v2080_v36 }
 0x625   :  { %v1557_v38 = vpop.eup %1556 }
 0x626   :  { %v941_v39 = vmul.f32 %v1557_v38, %v1555_v37 }
 0x628   :  { %v942_v40 = vpack.c.bf16 %v941_v39, %v941_v39 }
 0x62a   :  { %983 = vmatmul.mubr.bf16.vlgmr.msra.gmra.mxu0 %v942_v40  ;;  %1024 = vmatmul.mubr.bf16.vlgmr.msra.gmra.mxu1 %v942_v40 }
 0x62b   :  { %1065 = vmatpush1.bf16.msra.mxu0 %v1596_v41  ;;  %1106 = vmatpush1.bf16.msra.mxu1 %v1597_v43 }
 0x62c   :  { %1066 = vmatprep.subr.bf16.mxu0 %v1598_v44  ;;  %1107 = vmatprep.subr.bf16.mxu1 %v1599_v1 }
 0x62d   :  { %1096 = vmatprep.mubr.bf16.mxu0 %v1719_v0  ;;  %1137 = vmatprep.mubr.bf16.mxu1 %v1719_v0  ;;  %v1610_v0 = vld [vmem:[#allocation7 + $0x64] ss:$16 sps:$4 sm:$0xff]  }
 0x62f   :  { %1067 = vmatpush1.bf16.msra.mxu0 %v1600_v6  ;;  %1108 = vmatpush1.bf16.msra.mxu1 %v1601_v45  ;;  %v1720_v6 = vmov 0.0   ;;  %v1192_v45 = vld [vmem:[#allocation9 + $0x78] sm:$0xff] }
 0x630   :  { %1068 = vmatprep.subr.bf16.mxu0 %v1602_v46  ;;  %1109 = vmatprep.subr.bf16.mxu1 %v1603_v35  ;;  %v1191_v46 = vld [vmem:[#allocation9 + $0x70] sm:$0xff]  ;;  %v1189_v35 = vld [vmem:[#allocation9 + $0x60] sm:$0xff] }
 0x633   :  { %1069 = vmatpush1.bf16.msra.mxu0 %v1604_v47  ;;  %1110 = vmatpush1.bf16.msra.mxu1 %v1605_v49  ;;  %v1188_v47 = vld [vmem:[#allocation9 + $0x58] sm:$0xff]  ;;  %v1187_v49 = vld [vmem:[#allocation9 + $0x50] sm:$0xff] }
 0x634   :  { %1070 = vmatprep.subr.bf16.mxu0 %v1606_v50  ;;  %1111 = vmatprep.subr.bf16.mxu1 %v1607_v51  ;;  %v1186_v50 = vld [vmem:[#allocation9 + $0x48] sm:$0xff]  ;;  %v1185_v51 = vld [vmem:[#allocation9 + $0x40] sm:$0xff] }
 0x637   :  { %1071 = vmatpush1.bf16.msra.mxu0 %v1608_v52  ;;  %1112 = vmatpush1.bf16.msra.mxu1 %v1609_v42  ;;  %v1184_v52 = vld [vmem:[#allocation9 + $0x38] sm:$0xff]  ;;  %v1183_v42 = vld [vmem:[#allocation9 + $0x30] sm:$0xff] }
 0x638   :  { %1072 = vmatprep.subr.bf16.mxu0 %v1610_v0  ;;  %1113 = vmatprep.subr.bf16.mxu1 %v1611_v53  ;;  %v1182_v0 = vld [vmem:[#allocation9 + $0x28] sm:$0xff]  ;;  %v1181_v53 = vld [vmem:[#allocation9 + $0x20] sm:$0xff] }
 0x63b   :  { %1073 = vmatpush1.bf16.msra.mxu0 %v1612_v55  ;;  %1114 = vmatpush1.bf16.msra.mxu1 %v1613_v56  ;;  %v1180_v55 = vld [vmem:[#allocation9 + $0x18] sm:$0xff]  ;;  %v1179_v56 = vld [vmem:[#allocation9 + $0x10] sm:$0xff] }
 0x63c   :  { %1074 = vmatprep.subr.bf16.mxu0 %v1614_v57  ;;  %1115 = vmatprep.subr.bf16.mxu1 %v1615_v58  ;;  %v1178_v57 = vld [vmem:[#allocation9 + $0x8] sm:$0xff]  ;;  %v1177_v58 = vld [vmem:[#allocation9] sm:$0xff] }
 0x63f   :  { %1075 = vmatpush1.bf16.msra.mxu0 %v1616_v48  ;;  %1116 = vmatpush1.bf16.msra.mxu1 %v1617_v59  ;;  %v1058_v48 = vld [vmem:[#allocation4 + $0x70] sm:$0xff] }
 0x640   :  { %1076 = vmatprep.subr.bf16.mxu0 %v1618_v60  ;;  %1117 = vmatprep.subr.bf16.mxu1 %v1619_v61  ;;  %v1060_v59 = vunpack.c.l.bf16 %v1058_v48  ;;  %v1061_v60 = vunpack.c.h.bf16 %v1058_v48 }
 0x643   :  { %1077 = vmatpush1.bf16.msra.mxu0 %v1620_v62  ;;  %1118 = vmatpush1.bf16.msra.mxu1 %v1621_v2 }
 0x644   :  { %1078 = vmatprep.subr.bf16.mxu0 %v1622_v3  ;;  %1119 = vmatprep.subr.bf16.mxu1 %v1623_v4 }
 0x647   :  { %1079 = vmatpush1.bf16.msra.mxu0 %v1624_v5  ;;  %1120 = vmatpush1.bf16.msra.mxu1 %v1625_v7 }
 0x648   :  { %1368 = vmatprep.subr.mxu0 %v1720_v6 }
 0x6ea   :  { %v984_v11 = vpop.f32.mrf.mxu0  ;;  %v1025_v12 = vpop.f32.mrf.mxu1 }
 0x6eb   :  { %v985_v13 = vadd.f32 %v984_v11, %v946_v9  ;;  %v1026_v25 = vadd.f32 %v1025_v12, %v948_v24 }
 0x6ec   :  { %v986_v14 = vpop.f32.mrf.mxu0  ;;  %v1027_v15 = vpop.f32.mrf.mxu1 }
 0x6ed   :  { %v1343_v16 = vmul.f32 -1.442695, %v985_v13  ;;  %v987_v17 = vadd.f32 %v986_v14, %v947_v10  ;;  %v1345_v27 = vmul.f32 -1.442695, %v1026_v25  ;;  %v1028_v29 = vadd.f32 %v1027_v15, %v949_v26  ;;  %v1059_v10 = vld [vmem:[#allocation4 + $0x78] sm:$0xff] }
 0x6ee   :  { %v988_v18 = vpop.f32.mrf.mxu0  ;;  %v1029_v19 = vpop.f32.mrf.mxu1  ;;  %v1062_v14 = vunpack.c.l.bf16 %v1059_v10 }
 0x6ef   :  { %1558 = vpow2.f32 %v1343_v16  ;;  %v1344_v21 = vmul.f32 -1.442695, %v987_v17  ;;  %v1063_v16 = vunpack.c.h.bf16 %v1059_v10 }
 0x6f0   :  { %v989_v22 = vpop.f32.mrf.mxu0  ;;  %v1030_v23 = vpop.f32.mrf.mxu1 }
 0x6f1   :  { %1560 = vpow2.f32 %v1344_v21 }
 0x6f2   :  { %1562 = vpow2.f32 %v1345_v27 }
 0x6fc   :  { %v1559_v28 = vpop.eup %1558 }
 0x6fd   :  { %v1041_v30 = vadd.f32 1.0, %v1559_v28 }
 0x6fe   :  { %v1561_v31 = vpop.eup %1560 }
 0x6ff   :  { %1564 = vrcp.f32 %v1041_v30  ;;  %v1042_v33 = vadd.f32 1.0, %v1561_v31  ;;  %v1563_v54 = vpop.eup %1562 }
 0x700   :  { %1566 = vtanh.f32 %v1028_v29  ;;  %v1043_v37 = vadd.f32 1.0, %v1563_v54 }
 0x701   :  { %1568 = vrcp.f32 %v1042_v33 }
 0x702   :  { %1570 = vrcp.f32 %v1043_v37 }
 0x70c   :  { %v1565_v63 = vpop.eup %1564 }
 0x70d   :  { %v1567_v32 = vpop.eup %1566 }
 0x70e   :  { %v1569_v34 = vpop.eup %1568  ;;  %v1052_v39 = vmul.f32 %v1567_v32, %v1565_v63  ;;  %v1349_v32 = vld [vmem:[%s2099_s3] ss:$0 sm:$0xff] }
 0x70f   :  { %v1051_v38 = vmul.f32 %v1569_v34, %v2080_v36  ;;  %v1571_v41 = vpop.eup %1570  ;;  %v1190_v36 = vld [vmem:[#allocation9 + $0x68] sm:$0xff] }
 0x711   :  { %v2086_v40 = vadd.f32 %v1052_v39, %v1051_v38 }
 0x713   :  { %1572 = vtanh.f32 %v2086_v40 }
 0x720   :  { %v1573_v43 = vpop.eup %1572 }
 0x721   :  { %v1055_v44 = vmul.f32 %v1573_v43, %v1571_v41 }
 0x723   :  { %v1056_v1 = vpack.c.bf16 %v1055_v44, %v1055_v44 }
 0x725   :  { %1097 = vmatmul.mubr.bf16.vlgmr.msra.gmra.mxu0 %v1056_v1  ;;  %1138 = vmatmul.mubr.bf16.vlgmr.msra.gmra.mxu1 %v1056_v1 }
 0x726   :  { %1369 = vmatpush3.msra.mxu0 %v1192_v45  ;;  %1400 = vmatprep.mubr.msk.f32.mxu0 %vm1721_vm0, %v1720_v6 }
 0x727   :  { %1370 = vmatprep.subr.mxu0 %v1720_v6 }
 0x728   :  { %1371 = vmatpush3.msra.mxu0 %v1191_v46 }
 0x729   :  { %1372 = vmatprep.subr.mxu0 %v1720_v6 }
 0x72a   :  { %1373 = vmatpush3.msra.mxu0 %v1190_v36 }
 0x72b   :  { %1374 = vmatprep.subr.mxu0 %v1720_v6 }
 0x72c   :  { %1375 = vmatpush3.msra.mxu0 %v1189_v35 }
 0x72d   :  { %1376 = vmatprep.subr.mxu0 %v1720_v6 }
 0x72e   :  { %1377 = vmatpush3.msra.mxu0 %v1188_v47 }
 0x72f   :  { %1378 = vmatprep.subr.mxu0 %v1720_v6 }
 0x730   :  { %1379 = vmatpush3.msra.mxu0 %v1187_v49 }
 0x731   :  { %1380 = vmatprep.subr.mxu0 %v1720_v6 }
 0x732   :  { %1381 = vmatpush3.msra.mxu0 %v1186_v50 }
 0x733   :  { %1382 = vmatprep.subr.mxu0 %v1720_v6 }
 0x734   :  { %1383 = vmatpush3.msra.mxu0 %v1185_v51 }
 0x735   :  { %1384 = vmatprep.subr.mxu0 %v1720_v6 }
 0x736   :  { %1385 = vmatpush3.msra.mxu0 %v1184_v52 }
 0x737   :  { %1386 = vmatprep.subr.mxu0 %v1720_v6 }
 0x738   :  { %1387 = vmatpush3.msra.mxu0 %v1183_v42 }
 0x739   :  { %1388 = vmatprep.subr.mxu0 %v1720_v6 }
 0x73a   :  { %1389 = vmatpush3.msra.mxu0 %v1182_v0 }
 0x73b   :  { %1390 = vmatprep.subr.mxu0 %v1720_v6 }
 0x73c   :  { %1391 = vmatpush3.msra.mxu0 %v1181_v53 }
 0x73d   :  { %1392 = vmatprep.subr.mxu0 %v1720_v6 }
 0x73e   :  { %1393 = vmatpush3.msra.mxu0 %v1180_v55 }
 0x73f   :  { %1394 = vmatprep.subr.mxu0 %v1720_v6 }
 0x740   :  { %1395 = vmatpush3.msra.mxu0 %v1179_v56 }
 0x741   :  { %1396 = vmatprep.subr.mxu0 %v1720_v6 }
 0x742   :  { %1397 = vmatpush3.msra.mxu0 %v1178_v57 }
 0x743   :  { %1398 = vmatprep.subr.mxu0 %v1720_v6 }
 0x744   :  { %1399 = vmatpush3.msra.mxu0 %v1177_v58 }
 0x7e5   :  { %v1098_v61 = vpop.f32.mrf.mxu0  ;;  %v1139_v62 = vpop.f32.mrf.mxu1 }
 0x7e6   :  { %v1099_v2 = vadd.f32 %v1098_v61, %v1060_v59  ;;  %v1140_v15 = vadd.f32 %v1139_v62, %v1062_v14 }
 0x7e7   :  { %v1100_v3 = vpop.f32.mrf.mxu0  ;;  %v1141_v4 = vpop.f32.mrf.mxu1 }
 0x7e8   :  { %v1346_v5 = vmul.f32 -1.442695, %v1099_v2  ;;  %v1101_v7 = vadd.f32 %v1100_v3, %v1061_v60  ;;  %v1348_v17 = vmul.f32 -1.442695, %v1140_v15  ;;  %v1142_v19 = vadd.f32 %v1141_v4, %v1063_v16 }
 0x7e9   :  { %v1102_v8 = vpop.f32.mrf.mxu0  ;;  %v1143_v9 = vpop.f32.mrf.mxu1 }
 0x7ea   :  { %1574 = vpow2.f32 %v1346_v5  ;;  %v1347_v11 = vmul.f32 -1.442695, %v1101_v7 }
 0x7eb   :  { %v1103_v12 = vpop.f32.mrf.mxu0  ;;  %v1144_v13 = vpop.f32.mrf.mxu1 }
 0x7ec   :  { %1576 = vpow2.f32 %v1347_v11 }
 0x7ed   :  { %1578 = vpow2.f32 %v1348_v17 }
 0x7f7   :  { %v1575_v18 = vpop.eup %1574 }
 0x7f8   :  { %v1155_v20 = vadd.f32 1.0, %v1575_v18 }
 0x7f9   :  { %v1577_v21 = vpop.eup %1576 }
 0x7fa   :  { %1580 = vrcp.f32 %v1155_v20  ;;  %v1156_v22 = vadd.f32 1.0, %v1577_v21  ;;  %v1579_v23 = vpop.eup %1578 }
 0x7fb   :  { %1582 = vtanh.f32 %v1142_v19  ;;  %v1157_v27 = vadd.f32 1.0, %v1579_v23 }
 0x7fc   :  { %1584 = vrcp.f32 %v1156_v22 }
 0x7fd   :  { %1586 = vrcp.f32 %v1157_v27 }
 0x807   :  { %v1581_v24 = vpop.eup %1580 }
 0x808   :  { %v1583_v25 = vpop.eup %1582 }
 0x809   :  { %v1585_v26 = vpop.eup %1584  ;;  %v1166_v29 = vmul.f32 %v1583_v25, %v1581_v24 }
 0x80a   :  { %v1165_v28 = vmul.f32 %v1585_v26, %v2086_v40  ;;  %v1587_v31 = vpop.eup %1586 }
 0x80c   :  { %v1167_v30 = vadd.f32 %v1166_v29, %v1165_v28 }
 0x80e   :  { %1588 = vtanh.f32 %v1167_v30 }
 0x81b   :  { %v1589_v33 = vpop.eup %1588 }
 0x81c   :  { %v1169_v54 = vmul.f32 %v1589_v33, %v1587_v31 }
 0x81e   :  { %v1170_v63 = vpack.c.bf16 %v1169_v54, %v1169_v54  ;;  %1401 = vmatmul.mubr.f32.vlgmr.msra.gmra.mxu0 %v1169_v54 }
 0x820   :  { %1171 = vst [vmem:[#allocation2] sm:$0xf] %v1170_v63 }
 0x8de   :  { %v1266_v34 = vpop.f32.mrf.mxu0 }
 0x8df   :  { %v1267_v37 = vadd.f32 %v1349_v32, %v1266_v34 }
 0x8e0   :  { %v1402_v38 = vpop.f32.mrf.mxu0 }
 0x8e1   :  { %v1350_v39 = vmul.f32 -1.442695, %v1267_v37 }
 0x8e3   :  { %1590 = vpow2.f32 %v1350_v39 }
 0x8f0   :  { %v1591_v40 = vpop.eup %1590 }
 0x8f1   :  { %v1273_v41 = vadd.f32 1.0, %v1591_v40 }
 0x8f3   :  { %1592 = vrcp.f32 %v1273_v41 }
 0x900   :  { %v1593_v43 = vpop.eup %1592 }
 0x901   :  { %1276 = vst [vmem:[#allocation10] sm:$0xff] %v1593_v43 }
 0x902   :  { %1697 = shalt.err (!%p1694_p5)
}
 0x903   :  { %1286 = dma.vmem_to_hbm [thread:$0]  %s1284_s8, 128, %s2100_s4, [#allocation6]  }
 0x904   :  { %1710 = dma.done.wait [#allocation6], 128  }
 0x905   :  { %1711 = vsyncadd [#allocation6], 4294967168 }
 0x906   :  { %1290 = vsyncpa [#allocation5], 1 }
 0x907   :  { %1291 = vsyncpa [#allocation8], 1 }
 0x908   :  { %1292 = vsyncpa [#allocation6], 1 }

</bundles_post_ra>
